<compile_context>
chip_gen: v5e
topology: v5e:2x2
jax: 0.10.0
libtpu: 0.0.40
codegen_flags: <defaults>
</compile_context>

<pallas_src>
import functools
import math

import jax
import jax.numpy as jnp
from jax.experimental import pallas as pl
from jax.experimental.pallas import tpu as pltpu


NEG_INF = -1e10


# ----------------------------- helpers -------------------------------------

def _round_up(n, m):
    return ((n + m - 1) // m) * m


def _pick_tile(n, target):
    """Row tile: multiple of 8, <= target (rows get padded to a multiple)."""
    t = min(target, _round_up(n, 8))
    t -= t % 8
    return max(t, 8)


def _vmem_limit(est_block_bytes):
    """Scoped-VMEM hint: double-buffered resident blocks + temp headroom."""
    return int(min(max(2 * est_block_bytes + (16 << 20), 32 << 20), 100 << 20))


def _layer_norm(y, g, b, eps):
    # one-pass mean / variance (single stats reduction sweep)
    mu = jnp.mean(y, axis=-1, keepdims=True)
    ms = jnp.mean(y * y, axis=-1, keepdims=True)
    var = jnp.maximum(ms - mu * mu, 0.0)
    return (y - mu) * jax.lax.rsqrt(var + eps) * g + b


def _attend(q, k, v, bias2d, wo, bo, n_heads, scale, matmul_dtype,
            p_store=None):
    """softmax(q k^T * scale + bias) v, then ONE full-width Wo projection.

    Per-head attention outputs are packed lane-dense into (rows, D) so the
    output projection is a single (rows, D) @ (D, D) matmul at full MXU
    cadence (instead of H contraction-K=dk matmuls)."""
    D = q.shape[-1]
    dk = D // n_heads
    approx = jnp.dtype(matmul_dtype) != jnp.dtype(jnp.float32)

    heads = []
    # TODO(synk): for H >= 8 at long sequence lengths convert this static
    # unroll into a lax.fori_loop carrying a (rows, D) accumulator (bounds
    # vreg live ranges) and block the key axis flash-style.
    for h in range(n_heads):
        lo, hi = h * dk, (h + 1) * dk
        qh = q[:, lo:hi]
        kh = k[:, lo:hi]
        vh = v[:, lo:hi]
        s = jax.lax.dot_general(                      # (rows, Tk) scores
            qh.astype(matmul_dtype), kh.astype(matmul_dtype),
            (((1,), (1,)), ((), ())),
            preferred_element_type=jnp.float32)
        s = s * scale + bias2d
        m = jnp.max(s, axis=-1, keepdims=True)
        e = jnp.exp(s - m)
        denom = jnp.sum(e, axis=-1, keepdims=True)
        p = e * pl.reciprocal(denom, approx=approx)   # EUP when approx=True
        if p_store is not None:
            p_store(h, p)
        heads.append(jnp.dot(p.astype(matmul_dtype), vh.astype(matmul_dtype),
                             preferred_element_type=jnp.float32))
    a = jnp.concatenate(heads, axis=-1)               # (rows, D) lane-dense
    return jnp.dot(a.astype(matmul_dtype), wo.astype(matmul_dtype),
                   preferred_element_type=jnp.float32) + bo


# ----------------------------- kernels --------------------------------------

def _self_attn_ln_kernel(x_ref, bias_ref, wqkv_ref, bqkv_ref, wo_ref, bo_ref,
                         g_ref, b_ref, o_ref, *,
                         n_heads, scale, eps, matmul_dtype, causal):
    """LayerNorm(x + SelfAttention(x))   —   one (B,) grid step per batch elem."""
    x = x_ref[0]                                      # (T, D) input / residual
    T, D = x.shape

    # fused Q|K|V projection: one (T, D) @ (D, 3D) MXU pass
    qkv = jnp.dot(x.astype(matmul_dtype), wqkv_ref[...].astype(matmul_dtype),
                  preferred_element_type=jnp.float32) + bqkv_ref[...]
    q, k, v = qkv[:, :D], qkv[:, D:2 * D], qkv[:, 2 * D:]

    # additive mask bias — broadcast / causal-filled ONCE (not per head);
    # causal structure generated in-kernel (never DMA'd from HBM).
    bias2d = jnp.broadcast_to(bias_ref[0].astype(jnp.float32), (T, T))
    if causal:
        row = jax.lax.broadcasted_iota(jnp.int32, (T, T), 0)
        col = jax.lax.broadcasted_iota(jnp.int32, (T, T), 1)
        bias2d = jnp.where(row >= col, bias2d, NEG_INF)

    attn = _attend(q, k, v, bias2d, wo_ref[...], bo_ref[...],
                   n_heads, scale, matmul_dtype)
    y = x.astype(jnp.float32) + attn
    o_ref[0] = _layer_norm(y, g_ref[...], b_ref[...], eps).astype(o_ref.dtype)


def _cross_attn_ln_kernel(q_ref, kv_ref, bias_ref, wq_ref, bq_ref, wkv_ref,
                          bkv_ref, wo_ref, bo_ref, g_ref, b_ref,
                          o_ref, p_ref, kv_scr, *,
                          n_heads, scale, eps, matmul_dtype):
    """LayerNorm(q + CrossAttention(q, kv)) — grid = (batch, query tile)."""
    qi = pl.program_id(1)
    x = q_ref[0]                                      # (tq, D) query tile
    tq, D = x.shape
    Tk = kv_scr.shape[0]

    # K|V projection once per batch element; query-tile axis is the inner,
    # sequential ("arbitrary") grid axis so the scratch persists across it.
    @pl.when(qi == 0)
    def _():
        kv = kv_ref[0]
        kv_scr[...] = (jnp.dot(kv.astype(matmul_dtype),
                               wkv_ref[...].astype(matmul_dtype),
                               preferred_element_type=jnp.float32)
                       + bkv_ref[...]).astype(kv_scr.dtype)

    q = jnp.dot(x.astype(matmul_dtype), wq_ref[...].astype(matmul_dtype),
                preferred_element_type=jnp.float32) + bq_ref[...]
    kvp = kv_scr[...]
    k, v = kvp[:, :D], kvp[:, D:]

    # broadcast the (1, Tk) / (tq, Tk) bias once, outside the head loop
    bias2d = jnp.broadcast_to(bias_ref[0].astype(jnp.float32), (tq, Tk))

    def p_store(h, p):
        p_ref[0, h] = p.astype(p_ref.dtype)

    attn = _attend(q, k, v, bias2d, wo_ref[...], bo_ref[...],
                   n_heads, scale, matmul_dtype, p_store=p_store)
    y = x.astype(jnp.float32) + attn
    o_ref[0] = _layer_norm(y, g_ref[...], b_ref[...], eps).astype(o_ref.dtype)


def _ffn_ln_kernel(x_ref, w1_ref, b1_ref, w2_ref, b2_ref, g_ref, b_ref, o_ref,
                   *, eps, matmul_dtype):
    """LayerNorm(x + W2 relu(W1 x)) on a (tm, D) row tile."""
    x = x_ref[...]
    h = jnp.dot(x.astype(matmul_dtype), w1_ref[...].astype(matmul_dtype),
                preferred_element_type=jnp.float32) + b1_ref[...]
    h = jnp.maximum(h, 0.0)
    y = jnp.dot(h.astype(matmul_dtype), w2_ref[...].astype(matmul_dtype),
                preferred_element_type=jnp.float32) + b2_ref[...]
    z = x.astype(jnp.float32) + y
    o_ref[...] = _layer_norm(z, g_ref[...], b_ref[...], eps).astype(o_ref.dtype)


# ----------------------------- wrappers --------------------------------------

def fused_self_attn_layer(x, key_mask, mp, ln_g, ln_b, *, n_heads, causal=True,
                          eps=1e-5, matmul_dtype=jnp.bfloat16):
    """LayerNorm(x + MHA(x, x, x, mask)).  `key_mask` is None, (B,1,1,T)
    key-padding, or a general (B,1,T,T) mask; `causal` additionally applies
    the lower-triangular structure generated in-kernel."""
    B, T, D = x.shape
    dk = D // n_heads

    if key_mask is None:
        bias = jnp.zeros((B, 1, T), jnp.float32)
    else:
        bias = jnp.where(key_mask == 0, NEG_INF, 0.0).astype(jnp.float32)
        bias = bias.reshape(B, -1, T)
    Mq = bias.shape[1]

    itemsize = jnp.dtype(matmul_dtype).itemsize
    est = (2 * T * D * x.dtype.itemsize + Mq * T * 4
           + (3 * D * D + D * D) * itemsize
           + 4 * T * 3 * D + 2 * 4 * T * T)

    kernel = functools.partial(_self_attn_ln_kernel, n_heads=n_heads,
                               scale=1.0 / math.sqrt(dk), eps=eps,
                               matmul_dtype=matmul_dtype, causal=causal)
    return pl.pallas_call(
        kernel,
        out_shape=jax.ShapeDtypeStruct((B, T, D), x.dtype),
        grid=(B,),
        in_specs=[
            pl.BlockSpec((1, T, D), lambda b: (b, 0, 0)),     # x (residual)
            pl.BlockSpec((1, Mq, T), lambda b: (b, 0, 0)),    # key-pad bias
            pl.BlockSpec((D, 3 * D), lambda b: (0, 0)),       # Wq|Wk|Wv
            pl.BlockSpec((1, 3 * D), lambda b: (0, 0)),
            pl.BlockSpec((D, D), lambda b: (0, 0)),           # Wo
            pl.BlockSpec((1, D), lambda b: (0, 0)),
            pl.BlockSpec((1, D), lambda b: (0, 0)),           # LN gamma
            pl.BlockSpec((1, D), lambda b: (0, 0)),           # LN beta
        ],
        out_specs=pl.BlockSpec((1, T, D), lambda b: (b, 0, 0)),
        compiler_params=pltpu.CompilerParams(
            dimension_semantics=("parallel",),
            vmem_limit_bytes=_vmem_limit(est)),
    )(x, bias, mp["wqkv"], mp["bqkv"], mp["wo"], mp["bo"], ln_g, ln_b)


def fused_cross_attn_layer(q_in, kv_in, mask, mp, ln_g, ln_b, *, n_heads,
                           eps=1e-5, matmul_dtype=jnp.bfloat16,
                           probs_dtype=jnp.bfloat16, q_tile=256):
    """LayerNorm(q_in + MHA(q_in, kv_in, kv_in, mask)); returns (out, probs)."""
    B, Tq, D = q_in.shape
    Tk = kv_in.shape[1]
    dk = D // n_heads
    H = n_heads

    bias = jnp.where(mask == 0, NEG_INF, 0.0).astype(jnp.float32)
    bias = bias.reshape(B, -1, Tk)
    Mq = bias.shape[1]

    # query-row tiling (bounds the probs block / score matrix in VMEM)
    tq = _pick_tile(Tq, q_tile)
    Tqp = _round_up(Tq, tq)
    if Tqp != Tq:
        q_in = jnp.pad(q_in, ((0, 0), (0, Tqp - Tq), (0, 0)))
        if Mq != 1:
            bias = jnp.pad(bias, ((0, 0), (0, Tqp - Tq), (0, 0)))
    nq = Tqp // tq

    if Mq == 1:
        bias_spec = pl.BlockSpec((1, 1, Tk), lambda b, i: (b, 0, 0))
    else:
        bias_spec = pl.BlockSpec((1, tq, Tk), lambda b, i: (b, i, 0))

    itemsize = jnp.dtype(matmul_dtype).itemsize
    pbytes = jnp.dtype(probs_dtype).itemsize
    est = (2 * tq * D * 4 + Tk * D * q_in.dtype.itemsize
           + (1 if Mq == 1 else tq) * Tk * 4
           + (D * D + D * 2 * D) * itemsize
           + Tk * 2 * D * itemsize
           + H * tq * Tk * pbytes
           + 2 * 4 * tq * Tk + 4 * tq * D)

    kernel = functools.partial(_cross_attn_ln_kernel, n_heads=n_heads,
                               scale=1.0 / math.sqrt(dk), eps=eps,
                               matmul_dtype=matmul_dtype)
    out, probs = pl.pallas_call(
        kernel,
        out_shape=(jax.ShapeDtypeStruct((B, Tqp, D), q_in.dtype),
                   jax.ShapeDtypeStruct((B, H, Tqp, Tk), probs_dtype)),
        grid=(B, nq),
        in_specs=[
            pl.BlockSpec((1, tq, D), lambda b, i: (b, i, 0)),   # query tile
            pl.BlockSpec((1, Tk, D), lambda b, i: (b, 0, 0)),   # keys/values
            bias_spec,                                          # mask bias
            pl.BlockSpec((D, D), lambda b, i: (0, 0)),          # Wq
            pl.BlockSpec((1, D), lambda b, i: (0, 0)),
            pl.BlockSpec((D, 2 * D), lambda b, i: (0, 0)),      # Wk|Wv
            pl.BlockSpec((1, 2 * D), lambda b, i: (0, 0)),
            pl.BlockSpec((D, D), lambda b, i: (0, 0)),          # Wo
            pl.BlockSpec((1, D), lambda b, i: (0, 0)),
            pl.BlockSpec((1, D), lambda b, i: (0, 0)),          # LN gamma
            pl.BlockSpec((1, D), lambda b, i: (0, 0)),          # LN beta
        ],
        out_specs=(pl.BlockSpec((1, tq, D), lambda b, i: (b, i, 0)),
                   pl.BlockSpec((1, H, tq, Tk), lambda b, i: (b, 0, i, 0))),
        scratch_shapes=[pltpu.VMEM((Tk, 2 * D), matmul_dtype)],  # K|V cache
        compiler_params=pltpu.CompilerParams(
            dimension_semantics=("parallel", "arbitrary"),
            vmem_limit_bytes=_vmem_limit(est)),
    )(q_in, kv_in, bias, mp["wq"], mp["bq"], mp["wkv"], mp["bkv"],
      mp["wo"], mp["bo"], ln_g, ln_b)

    if Tqp != Tq:
        out = out[:, :Tq]
        probs = probs[:, :, :Tq]
    return out, probs


def fused_ffn_layer(x, w1, b1, w2, b2, ln_g, ln_b, *, eps=1e-5,
                    matmul_dtype=jnp.bfloat16, row_tile=512):
    """LayerNorm(x + linear_2(relu(linear_1(x)))), tiled/padded over B*T rows."""
    B, T, D = x.shape
    F_ = w1.shape[1]
    M = B * T
    x2 = x.reshape(M, D)

    tm = _pick_tile(M, row_tile)
    Mp = _round_up(M, tm)
    if Mp != M:                       # pad instead of whole-array fallback
        x2 = jnp.pad(x2, ((0, Mp - M), (0, 0)))

    itemsize = jnp.dtype(matmul_dtype).itemsize
    est = (2 * tm * D * x.dtype.itemsize + (D * F_ + F_ * D) * itemsize
           + 4 * tm * F_ + 4 * tm * D)

    kernel = functools.partial(_ffn_ln_kernel, eps=eps,
                               matmul_dtype=matmul_dtype)
    out = pl.pallas_call(
        kernel,
        out_shape=jax.ShapeDtypeStruct((Mp, D), x.dtype),
        grid=(Mp // tm,),
        in_specs=[
            pl.BlockSpec((tm, D), lambda i: (i, 0)),          # activations
            pl.BlockSpec((D, F_), lambda i: (0, 0)),          # W1 (resident)
            pl.BlockSpec((1, F_), lambda i: (0, 0)),
            pl.BlockSpec((F_, D), lambda i: (0, 0)),          # W2 (resident)
            pl.BlockSpec((1, D), lambda i: (0, 0)),
            pl.BlockSpec((1, D), lambda i: (0, 0)),           # LN gamma
            pl.BlockSpec((1, D), lambda i: (0, 0)),           # LN beta
        ],
        out_specs=pl.BlockSpec((tm, D), lambda i: (i, 0)),
        compiler_params=pltpu.CompilerParams(
            dimension_semantics=("parallel",),
            vmem_limit_bytes=_vmem_limit(est)),
    )(x2, w1, b1, w2, b2, ln_g, ln_b)
    return out[:M].reshape(B, T, D)


def decoder_layer(trg, src, trg_key_mask, src_mask, fparams, *, n_heads,
                  causal=True, matmul_dtype=jnp.bfloat16,
                  probs_dtype=jnp.bfloat16):
    """DecoderLayer forward.  `trg_key_mask` is the (B,1,1,T_trg) padding mask
    (the causal part of `make_trg_mask` is generated in-kernel)."""
    # 1) masked self-attention + residual + LN1 (probs discarded → not stored)
    trg = fused_self_attn_layer(trg, trg_key_mask, fparams["self_attn"],
                                fparams["ln1_g"], fparams["ln1_b"],
                                n_heads=n_heads, causal=causal,
                                matmul_dtype=matmul_dtype)
    # 2) cross-attention + residual + LN2 (probs returned)
    trg, attn_probs = fused_cross_attn_layer(
        trg, src, src_mask, fparams["cross_attn"],
        fparams["ln2_g"], fparams["ln2_b"], n_heads=n_heads,
        matmul_dtype=matmul_dtype, probs_dtype=probs_dtype)
    # 3) position-wise FFN + residual + LN3
    trg = fused_ffn_layer(trg, fparams["ffn_w1"], fparams["ffn_b1"],
                          fparams["ffn_w2"], fparams["ffn_b2"],
                          fparams["ln3_g"], fparams["ln3_b"],
                          matmul_dtype=matmul_dtype)
    return trg, attn_probs


# ----------------------------- parameters ------------------------------------

def _init_linear(key, fan_in, fan_out):
    kw, kb = jax.random.split(key)
    bound = 1.0 / math.sqrt(fan_in)
    w = jax.random.uniform(kw, (fan_in, fan_out), jnp.float32, -bound, bound)
    b = jax.random.uniform(kb, (fan_out,), jnp.float32, -bound, bound)
    return w, b


def init_params(key, d_model, d_ffn):
    """PyTorch-layout parameters (used by the plain-JAX reference)."""
    keys = jax.random.split(key, 12)

    def mha_params(ks):
        wq, bq = _init_linear(ks[0], d_model, d_model)
        wk, bk = _init_linear(ks[1], d_model, d_model)
        wv, bv = _init_linear(ks[2], d_model, d_model)
        wo, bo = _init_linear(ks[3], d_model, d_model)
        return dict(wq=wq, bq=bq, wk=wk, bk=bk, wv=wv, bv=bv, wo=wo, bo=bo)

    params = {
        "self_attn": mha_params(keys[0:4]),
        "cross_attn": mha_params(keys[4:8]),
        "ln1_g": jnp.ones((d_model,), jnp.float32),
        "ln1_b": jnp.zeros((d_model,), jnp.float32),
        "ln2_g": jnp.ones((d_model,), jnp.float32),
        "ln2_b": jnp.zeros((d_model,), jnp.float32),
        "ln3_g": jnp.ones((d_model,), jnp.float32),
        "ln3_b": jnp.zeros((d_model,), jnp.float32),
    }
    w1, b1 = _init_linear(keys[8], d_model, d_ffn)
    w2, b2 = _init_linear(keys[9], d_ffn, d_model)
    params.update(ffn_w1=w1, ffn_b1=b1, ffn_w2=w2, ffn_b2=b2)
    return params


def fuse_params(p, matmul_dtype=jnp.bfloat16):
    """Repack PyTorch-layout params into the fused kernel layout (done once):
    Q|K|V / K|V concatenated, weight matrices stored at rest in matmul_dtype
    (halves HBM + resident VMEM for bf16), biases / LN params kept f32, 2-D."""
    md = matmul_dtype
    sa, ca = p["self_attn"], p["cross_attn"]
    return dict(
        self_attn=dict(
            wqkv=jnp.concatenate([sa["wq"], sa["wk"], sa["wv"]], 1).astype(md),
            bqkv=jnp.concatenate([sa["bq"], sa["bk"], sa["bv"]]).reshape(1, -1),
            wo=sa["wo"].astype(md), bo=sa["bo"].reshape(1, -1),
        ),
        cross_attn=dict(
            wq=ca["wq"].astype(md), bq=ca["bq"].reshape(1, -1),
            wkv=jnp.concatenate([ca["wk"], ca["wv"]], 1).astype(md),
            bkv=jnp.concatenate([ca["bk"], ca["bv"]]).reshape(1, -1),
            wo=ca["wo"].astype(md), bo=ca["bo"].reshape(1, -1),
        ),
        ffn_w1=p["ffn_w1"].astype(md), ffn_b1=p["ffn_b1"].reshape(1, -1),
        ffn_w2=p["ffn_w2"].astype(md), ffn_b2=p["ffn_b2"].reshape(1, -1),
        ln1_g=p["ln1_g"].reshape(1, -1), ln1_b=p["ln1_b"].reshape(1, -1),
        ln2_g=p["ln2_g"].reshape(1, -1), ln2_b=p["ln2_b"].reshape(1, -1),
        ln3_g=p["ln3_g"].reshape(1, -1), ln3_b=p["ln3_b"].reshape(1, -1),
    )


# ----------------------------- reference (plain JAX) --------------------------

def _ref_mha(q, k, v, mask, p, n_heads):
    B, Tq, D = q.shape
    Tk = k.shape[1]
    dk = D // n_heads
    Q = (q @ p["wq"] + p["bq"]).reshape(B, Tq, n_heads, dk).transpose(0, 2, 1, 3)
    K = (k @ p["wk"] + p["bk"]).reshape(B, Tk, n_heads, dk).transpose(0, 2, 1, 3)
    V = (v @ p["wv"] + p["bv"]).reshape(B, Tk, n_heads, dk).transpose(0, 2, 1, 3)
    s = jnp.einsum("bhqd,bhkd->bhqk", Q, K) / math.sqrt(dk)
    s = jnp.where(mask == 0, NEG_INF, s)
    probs = jax.nn.softmax(s, axis=-1)
    A = jnp.einsum("bhqk,bhkd->bhqd", probs, V)
    A = A.transpose(0, 2, 1, 3).reshape(B, Tq, D)
    return A @ p["wo"] + p["bo"], probs


def _ref_ln(x, g, b, eps=1e-5):
    mu = jnp.mean(x, axis=-1, keepdims=True)
    var = jnp.mean((x - mu) ** 2, axis=-1, keepdims=True)
    return (x - mu) * jax.lax.rsqrt(var + eps) * g + b


def _ref_decoder(trg, src, trg_mask, src_mask, params, n_heads):
    a, _ = _ref_mha(trg, trg, trg, trg_mask, params["self_attn"], n_heads)
    trg = _ref_ln(trg + a, params["ln1_g"], params["ln1_b"])
    a, probs = _ref_mha(trg, src, src, src_mask, params["cross_attn"], n_heads)
    trg = _ref_ln(trg + a, params["ln2_g"], params["ln2_b"])
    h = jnp.maximum(trg @ params["ffn_w1"] + params["ffn_b1"], 0.0)
    a = h @ params["ffn_w2"] + params["ffn_b2"]
    trg = _ref_ln(trg + a, params["ln3_g"], params["ln3_b"])
    return trg, probs


# ----------------------------- main -------------------------------------------

if __name__ == "__main__":
    d_model, n_heads, d_ffn = 32, 4, 64
    B, T_trg, T_src = 2, 8, 16

    key = jax.random.PRNGKey(0)
    k_trg, k_src, k_par = jax.random.split(key, 3)
    trg = jax.random.normal(k_trg, (B, T_trg, d_model), jnp.float32)
    src = jax.random.normal(k_src, (B, T_src, d_model), jnp.float32)

    # key-padding masks (what Transformer.make_*_mask produce before the tril)
    trg_key_mask = jnp.ones((B, 1, 1, T_trg), jnp.int32)
    src_valid = jnp.ones((B, T_src), jnp.int32).at[1, 12:].set(0)
    src_mask = src_valid[:, None, None, :]                   # (B,1,1,T_src)

    # full reference target mask = keypad & tril  (B,1,T_trg,T_trg)
    tril = jnp.tril(jnp.ones((T_trg, T_trg), jnp.int32))[None, None]
    trg_mask_full = trg_key_mask & tril

    params = init_params(k_par, d_model, d_ffn)
    ref_out, ref_probs = _ref_decoder(trg, src, trg_mask_full, src_mask,
                                      params, n_heads)

    # --- strict check: f32 matmul operands, f32 probs, exact reciprocal ---
    fp32 = fuse_params(params, jnp.float32)
    layer_f32 = jax.jit(functools.partial(
        decoder_layer, n_heads=n_heads, causal=True,
        matmul_dtype=jnp.float32, probs_dtype=jnp.float32))
    out32, probs32 = layer_f32(trg, src, trg_key_mask, src_mask, fp32)
    out32 = jax.block_until_ready(out32)
    probs32 = jax.block_until_ready(probs32)
    assert out32.shape == (B, T_trg, d_model)
    assert probs32.shape == (B, n_heads, T_trg, T_src)
    assert jnp.allclose(out32, ref_out, atol=1e-4, rtol=1e-4)
    assert jnp.allclose(probs32, ref_probs, atol=1e-4, rtol=1e-4)

    # --- production path: bf16 matmul operands / weights / probs ---
    fbf16 = fuse_params(params, jnp.bfloat16)
    layer_bf16 = jax.jit(functools.partial(
        decoder_layer, n_heads=n_heads, causal=True,
        matmul_dtype=jnp.bfloat16, probs_dtype=jnp.bfloat16))
    out16, probs16 = layer_bf16(trg, src, trg_key_mask, src_mask, fbf16)
    out16 = jax.block_until_ready(out16)
    probs16 = jax.block_until_ready(probs16).astype(jnp.float32)
    assert jnp.allclose(out16, ref_out, atol=5e-2, rtol=5e-2)
    assert jnp.allclose(probs16, ref_probs, atol=5e-2, rtol=5e-2)

    print("KERNEL_OK")
</pallas_src>

<mosaic_0001>
module attributes {stable_mosaic.version = 11 : i64} {
  func.func @_cross_attn_ln_kernel(%arg0: i32, %arg1: i32, %arg2: memref<1x8x32xf32, #tpu.memory_space<vmem>>, %arg3: memref<1x16x32xf32, #tpu.memory_space<vmem>>, %arg4: memref<1x1x16xf32, #tpu.memory_space<vmem>>, %arg5: memref<32x32xf32, #tpu.memory_space<vmem>>, %arg6: memref<1x32xf32, #tpu.memory_space<vmem>>, %arg7: memref<32x64xf32, #tpu.memory_space<vmem>>, %arg8: memref<1x64xf32, #tpu.memory_space<vmem>>, %arg9: memref<32x32xf32, #tpu.memory_space<vmem>>, %arg10: memref<1x32xf32, #tpu.memory_space<vmem>>, %arg11: memref<1x32xf32, #tpu.memory_space<vmem>>, %arg12: memref<1x32xf32, #tpu.memory_space<vmem>>, %arg13: memref<1x8x32xf32, #tpu.memory_space<vmem>>, %arg14: memref<1x4x8x16xf32, #tpu.memory_space<vmem>>, %arg15: memref<16x64xf32, #tpu.memory_space<vmem>>) attributes {dimension_semantics = [#tpu.dimension_semantics<parallel>, #tpu.dimension_semantics<arbitrary>], iteration_bounds = array<i64: 2, 1>, scalar_prefetch = 0 : i64, scratch_operands = 1 : i64, tpu.core_type = #tpu.core_type<tc>, window_params = [{transform_indices = @transform_0, window_bounds = array<i64: 1, 8, 32>}, {transform_indices = @transform_1, window_bounds = array<i64: 1, 16, 32>}, {transform_indices = @transform_2, window_bounds = array<i64: 1, 1, 16>}, {pipeline_mode = #tpu.pipeline_mode<synchronous>, transform_indices = @transform_3, window_bounds = array<i64: 32, 32>}, {pipeline_mode = #tpu.pipeline_mode<synchronous>, transform_indices = @transform_4, window_bounds = array<i64: 1, 32>}, {pipeline_mode = #tpu.pipeline_mode<synchronous>, transform_indices = @transform_5, window_bounds = array<i64: 32, 64>}, {pipeline_mode = #tpu.pipeline_mode<synchronous>, transform_indices = @transform_6, window_bounds = array<i64: 1, 64>}, {pipeline_mode = #tpu.pipeline_mode<synchronous>, transform_indices = @transform_7, window_bounds = array<i64: 32, 32>}, {pipeline_mode = #tpu.pipeline_mode<synchronous>, transform_indices = @transform_8, window_bounds = array<i64: 1, 32>}, {pipeline_mode = #tpu.pipeline_mode<synchronous>, transform_indices = @transform_9, window_bounds = array<i64: 1, 32>}, {pipeline_mode = #tpu.pipeline_mode<synchronous>, transform_indices = @transform_10, window_bounds = array<i64: 1, 32>}, {transform_indices = @transform_11, window_bounds = array<i64: 1, 8, 32>}, {transform_indices = @transform_12, window_bounds = array<i64: 1, 4, 8, 16>}]} {
    %c0 = arith.constant 0 : index
    %c0_0 = arith.constant 0 : index
    %c0_1 = arith.constant 0 : index
    %0 = vector.load %arg2[%c0, %c0_0, %c0_1] : memref<1x8x32xf32, #tpu.memory_space<vmem>>, vector<1x8x32xf32>
    %1 = vector.shape_cast %0 : vector<1x8x32xf32> to vector<8x32xf32>
    %c0_i32 = arith.constant 0 : i32
    %2 = arith.cmpi eq, %arg1, %c0_i32 : i32
    %3 = arith.extui %2 : i1 to i32
    %c0_i32_2 = arith.constant 0 : i32
    %4 = arith.cmpi ne, %3, %c0_i32_2 : i32
    scf.if %4 {
      %c0_63 = arith.constant 0 : index
      %c0_64 = arith.constant 0 : index
      %c0_65 = arith.constant 0 : index
      %137 = vector.load %arg3[%c0_63, %c0_64, %c0_65] : memref<1x16x32xf32, #tpu.memory_space<vmem>>, vector<1x16x32xf32>
      %138 = vector.shape_cast %137 : vector<1x16x32xf32> to vector<16x32xf32>
      %c0_66 = arith.constant 0 : index
      %c0_67 = arith.constant 0 : index
      %139 = vector.load %arg7[%c0_66, %c0_67] : memref<32x64xf32, #tpu.memory_space<vmem>>, vector<32x64xf32>
      %cst_68 = arith.constant dense<0.000000e+00> : vector<16x64xf32>
      %140 = tpu.matmul %138, %139, %cst_68 {dimension_numbers = #tpu.dot_dimension_numbers<[1], [0], [0], [1], [0, 0, 1, 1], [], []>} : vector<16x32xf32>, vector<32x64xf32>, vector<16x64xf32> -> vector<16x64xf32>
      %c0_69 = arith.constant 0 : index
      %c0_70 = arith.constant 0 : index
      %141 = vector.load %arg8[%c0_69, %c0_70] : memref<1x64xf32, #tpu.memory_space<vmem>>, vector<1x64xf32>
      %142 = vector.broadcast %141 : vector<1x64xf32> to vector<16x64xf32>
      %143 = arith.addf %140, %142 : vector<16x64xf32>
      %c0_71 = arith.constant 0 : index
      %c0_72 = arith.constant 0 : index
      %144 = vector.load %arg15[%c0_71, %c0_72] : memref<16x64xf32, #tpu.memory_space<vmem>>, vector<16x64xf32>
      tpu.vector_store %arg15[%c0_71, %c0_72], %143 {strides = array<i32>} : memref<16x64xf32, #tpu.memory_space<vmem>>, vector<16x64xf32>,
    } else {
    }
    %c0_3 = arith.constant 0 : index
    %c0_4 = arith.constant 0 : index
    %5 = vector.load %arg5[%c0_3, %c0_4] : memref<32x32xf32, #tpu.memory_space<vmem>>, vector<32x32xf32>
    %cst = arith.constant dense<0.000000e+00> : vector<8x32xf32>
    %6 = tpu.matmul %1, %5, %cst {dimension_numbers = #tpu.dot_dimension_numbers<[1], [0], [0], [1], [0, 0, 1, 1], [], []>} : vector<8x32xf32>, vector<32x32xf32>, vector<8x32xf32> -> vector<8x32xf32>
    %c0_5 = arith.constant 0 : index
    %c0_6 = arith.constant 0 : index
    %7 = vector.load %arg6[%c0_5, %c0_6] : memref<1x32xf32, #tpu.memory_space<vmem>>, vector<1x32xf32>
    %8 = vector.broadcast %7 : vector<1x32xf32> to vector<8x32xf32>
    %9 = arith.addf %6, %8 : vector<8x32xf32>
    %c0_7 = arith.constant 0 : index
    %c0_8 = arith.constant 0 : index
    %10 = vector.load %arg15[%c0_7, %c0_8] : memref<16x64xf32, #tpu.memory_space<vmem>>, vector<16x64xf32>
    %11 = vector.extract_strided_slice %10 {offsets = [0, 0], sizes = [16, 32], strides = [1, 1]} : vector<16x64xf32> to vector<16x32xf32>
    %12 = vector.extract_strided_slice %10 {offsets = [0, 32], sizes = [16, 32], strides = [1, 1]} : vector<16x64xf32> to vector<16x32xf32>
    %c0_9 = arith.constant 0 : index
    %c0_10 = arith.constant 0 : index
    %c0_11 = arith.constant 0 : index
    %13 = vector.load %arg4[%c0_9, %c0_10, %c0_11] : memref<1x1x16xf32, #tpu.memory_space<vmem>>, vector<1x1x16xf32>
    %14 = vector.shape_cast %13 : vector<1x1x16xf32> to vector<1x16xf32>
    %15 = vector.shape_cast %14 : vector<1x16xf32> to vector<1x16xf32>
    %16 = vector.broadcast %15 : vector<1x16xf32> to vector<8x16xf32>
    %c0_12 = arith.constant 0 : index
    %c0_13 = arith.constant 0 : index
    %17 = vector.load %arg9[%c0_12, %c0_13] : memref<32x32xf32, #tpu.memory_space<vmem>>, vector<32x32xf32>
    %c0_14 = arith.constant 0 : index
    %c0_15 = arith.constant 0 : index
    %18 = vector.load %arg10[%c0_14, %c0_15] : memref<1x32xf32, #tpu.memory_space<vmem>>, vector<1x32xf32>
    %19 = vector.extract_strided_slice %9 {offsets = [0, 0], sizes = [8, 8], strides = [1, 1]} : vector<8x32xf32> to vector<8x8xf32>
    %20 = vector.extract_strided_slice %11 {offsets = [0, 0], sizes = [16, 8], strides = [1, 1]} : vector<16x32xf32> to vector<16x8xf32>
    %21 = vector.extract_strided_slice %12 {offsets = [0, 0], sizes = [16, 8], strides = [1, 1]} : vector<16x32xf32> to vector<16x8xf32>
    %cst_16 = arith.constant dense<0.000000e+00> : vector<8x16xf32>
    %22 = tpu.matmul %19, %20, %cst_16 {dimension_numbers = #tpu.dot_dimension_numbers<[1], [1], [0], [0], [0, 0, 1, 0], [], []>} : vector<8x8xf32>, vector<16x8xf32>, vector<8x16xf32> -> vector<8x16xf32>
    %cst_17 = arith.constant 0.353553385 : f32
    %23 = vector.broadcast %cst_17 : f32 to vector<8x16xf32>
    %24 = arith.mulf %22, %23 : vector<8x16xf32>
    %25 = arith.addf %24, %16 : vector<8x16xf32>
    %cst_18 = arith.constant dense<0xFF800000> : vector<8xf32>
    %26 = vector.multi_reduction <maximumf>, %25, %cst_18 [1] : vector<8x16xf32> to vector<8xf32>
    %27 = vector.shape_cast %26 : vector<8xf32> to vector<8x1xf32>
    %28 = vector.broadcast %27 : vector<8x1xf32> to vector<8x16xf32>
    %29 = arith.subf %25, %28 : vector<8x16xf32>
    %30 = math.exp %29 : vector<8x16xf32>
    %cst_19 = arith.constant dense<0.000000e+00> : vector<8xf32>
    %31 = vector.multi_reduction <add>, %30, %cst_19 [1] : vector<8x16xf32> to vector<8xf32>
    %32 = vector.shape_cast %31 : vector<8xf32> to vector<8x1xf32>
    %33 = tpu.reciprocal %32 : vector<8x1xf32> -> vector<8x1xf32>
    %34 = vector.broadcast %33 : vector<8x1xf32> to vector<8x16xf32>
    %35 = arith.mulf %30, %34 : vector<8x16xf32>
    %c0_20 = arith.constant 0 : index
    %c0_21 = arith.constant 0 : index
    %c0_22 = arith.constant 0 : index
    %c0_23 = arith.constant 0 : index
    %36 = vector.load %arg14[%c0_20, %c0_21, %c0_22, %c0_23] : memref<1x4x8x16xf32, #tpu.memory_space<vmem>>, vector<1x1x8x16xf32>
    %37 = vector.shape_cast %36 : vector<1x1x8x16xf32> to vector<8x16xf32>
    %38 = vector.shape_cast %35 : vector<8x16xf32> to vector<1x1x8x16xf32>
    tpu.vector_store %arg14[%c0_20, %c0_21, %c0_22, %c0_23], %38 {strides = array<i32>} : memref<1x4x8x16xf32, #tpu.memory_space<vmem>>, vector<1x1x8x16xf32>,
    %cst_24 = arith.constant dense<0.000000e+00> : vector<8x8xf32>
    %39 = tpu.matmul %35, %21, %cst_24 {dimension_numbers = #tpu.dot_dimension_numbers<[1], [0], [0], [1], [0, 0, 1, 1], [], []>} : vector<8x16xf32>, vector<16x8xf32>, vector<8x8xf32> -> vector<8x8xf32>
    %40 = vector.extract_strided_slice %9 {offsets = [0, 8], sizes = [8, 8], strides = [1, 1]} : vector<8x32xf32> to vector<8x8xf32>
    %41 = vector.extract_strided_slice %11 {offsets = [0, 8], sizes = [16, 8], strides = [1, 1]} : vector<16x32xf32> to vector<16x8xf32>
    %42 = vector.extract_strided_slice %12 {offsets = [0, 8], sizes = [16, 8], strides = [1, 1]} : vector<16x32xf32> to vector<16x8xf32>
    %cst_25 = arith.constant dense<0.000000e+00> : vector<8x16xf32>
    %43 = tpu.matmul %40, %41, %cst_25 {dimension_numbers = #tpu.dot_dimension_numbers<[1], [1], [0], [0], [0, 0, 1, 0], [], []>} : vector<8x8xf32>, vector<16x8xf32>, vector<8x16xf32> -> vector<8x16xf32>
    %cst_26 = arith.constant 0.353553385 : f32
    %44 = vector.broadcast %cst_26 : f32 to vector<8x16xf32>
    %45 = arith.mulf %43, %44 : vector<8x16xf32>
    %46 = arith.addf %45, %16 : vector<8x16xf32>
    %cst_27 = arith.constant dense<0xFF800000> : vector<8xf32>
    %47 = vector.multi_reduction <maximumf>, %46, %cst_27 [1] : vector<8x16xf32> to vector<8xf32>
    %48 = vector.shape_cast %47 : vector<8xf32> to vector<8x1xf32>
    %49 = vector.broadcast %48 : vector<8x1xf32> to vector<8x16xf32>
    %50 = arith.subf %46, %49 : vector<8x16xf32>
    %51 = math.exp %50 : vector<8x16xf32>
    %cst_28 = arith.constant dense<0.000000e+00> : vector<8xf32>
    %52 = vector.multi_reduction <add>, %51, %cst_28 [1] : vector<8x16xf32> to vector<8xf32>
    %53 = vector.shape_cast %52 : vector<8xf32> to vector<8x1xf32>
    %54 = tpu.reciprocal %53 : vector<8x1xf32> -> vector<8x1xf32>
    %55 = vector.broadcast %54 : vector<8x1xf32> to vector<8x16xf32>
    %56 = arith.mulf %51, %55 : vector<8x16xf32>
    %c0_29 = arith.constant 0 : index
    %c1 = arith.constant 1 : index
    %c0_30 = arith.constant 0 : index
    %c0_31 = arith.constant 0 : index
    %57 = vector.load %arg14[%c0_29, %c1, %c0_30, %c0_31] : memref<1x4x8x16xf32, #tpu.memory_space<vmem>>, vector<1x1x8x16xf32>
    %58 = vector.shape_cast %57 : vector<1x1x8x16xf32> to vector<8x16xf32>
    %59 = vector.shape_cast %56 : vector<8x16xf32> to vector<1x1x8x16xf32>
    tpu.vector_store %arg14[%c0_29, %c1, %c0_30, %c0_31], %59 {strides = array<i32>} : memref<1x4x8x16xf32, #tpu.memory_space<vmem>>, vector<1x1x8x16xf32>,
    %cst_32 = arith.constant dense<0.000000e+00> : vector<8x8xf32>
    %60 = tpu.matmul %56, %42, %cst_32 {dimension_numbers = #tpu.dot_dimension_numbers<[1], [0], [0], [1], [0, 0, 1, 1], [], []>} : vector<8x16xf32>, vector<16x8xf32>, vector<8x8xf32> -> vector<8x8xf32>
    %61 = vector.extract_strided_slice %9 {offsets = [0, 16], sizes = [8, 8], strides = [1, 1]} : vector<8x32xf32> to vector<8x8xf32>
    %62 = vector.extract_strided_slice %11 {offsets = [0, 16], sizes = [16, 8], strides = [1, 1]} : vector<16x32xf32> to vector<16x8xf32>
    %63 = vector.extract_strided_slice %12 {offsets = [0, 16], sizes = [16, 8], strides = [1, 1]} : vector<16x32xf32> to vector<16x8xf32>
    %cst_33 = arith.constant dense<0.000000e+00> : vector<8x16xf32>
    %64 = tpu.matmul %61, %62, %cst_33 {dimension_numbers = #tpu.dot_dimension_numbers<[1], [1], [0], [0], [0, 0, 1, 0], [], []>} : vector<8x8xf32>, vector<16x8xf32>, vector<8x16xf32> -> vector<8x16xf32>
    %cst_34 = arith.constant 0.353553385 : f32
    %65 = vector.broadcast %cst_34 : f32 to vector<8x16xf32>
    %66 = arith.mulf %64, %65 : vector<8x16xf32>
    %67 = arith.addf %66, %16 : vector<8x16xf32>
    %cst_35 = arith.constant dense<0xFF800000> : vector<8xf32>
    %68 = vector.multi_reduction <maximumf>, %67, %cst_35 [1] : vector<8x16xf32> to vector<8xf32>
    %69 = vector.shape_cast %68 : vector<8xf32> to vector<8x1xf32>
    %70 = vector.broadcast %69 : vector<8x1xf32> to vector<8x16xf32>
    %71 = arith.subf %67, %70 : vector<8x16xf32>
    %72 = math.exp %71 : vector<8x16xf32>
    %cst_36 = arith.constant dense<0.000000e+00> : vector<8xf32>
    %73 = vector.multi_reduction <add>, %72, %cst_36 [1] : vector<8x16xf32> to vector<8xf32>
    %74 = vector.shape_cast %73 : vector<8xf32> to vector<8x1xf32>
    %75 = tpu.reciprocal %74 : vector<8x1xf32> -> vector<8x1xf32>
    %76 = vector.broadcast %75 : vector<8x1xf32> to vector<8x16xf32>
    %77 = arith.mulf %72, %76 : vector<8x16xf32>
    %c0_37 = arith.constant 0 : index
    %c2 = arith.constant 2 : index
    %c0_38 = arith.constant 0 : index
    %c0_39 = arith.constant 0 : index
    %78 = vector.load %arg14[%c0_37, %c2, %c0_38, %c0_39] : memref<1x4x8x16xf32, #tpu.memory_space<vmem>>, vector<1x1x8x16xf32>
    %79 = vector.shape_cast %78 : vector<1x1x8x16xf32> to vector<8x16xf32>
    %80 = vector.shape_cast %77 : vector<8x16xf32> to vector<1x1x8x16xf32>
    tpu.vector_store %arg14[%c0_37, %c2, %c0_38, %c0_39], %80 {strides = array<i32>} : memref<1x4x8x16xf32, #tpu.memory_space<vmem>>, vector<1x1x8x16xf32>,
    %cst_40 = arith.constant dense<0.000000e+00> : vector<8x8xf32>
    %81 = tpu.matmul %77, %63, %cst_40 {dimension_numbers = #tpu.dot_dimension_numbers<[1], [0], [0], [1], [0, 0, 1, 1], [], []>} : vector<8x16xf32>, vector<16x8xf32>, vector<8x8xf32> -> vector<8x8xf32>
    %82 = vector.extract_strided_slice %9 {offsets = [0, 24], sizes = [8, 8], strides = [1, 1]} : vector<8x32xf32> to vector<8x8xf32>
    %83 = vector.extract_strided_slice %11 {offsets = [0, 24], sizes = [16, 8], strides = [1, 1]} : vector<16x32xf32> to vector<16x8xf32>
    %84 = vector.extract_strided_slice %12 {offsets = [0, 24], sizes = [16, 8], strides = [1, 1]} : vector<16x32xf32> to vector<16x8xf32>
    %cst_41 = arith.constant dense<0.000000e+00> : vector<8x16xf32>
    %85 = tpu.matmul %82, %83, %cst_41 {dimension_numbers = #tpu.dot_dimension_numbers<[1], [1], [0], [0], [0, 0, 1, 0], [], []>} : vector<8x8xf32>, vector<16x8xf32>, vector<8x16xf32> -> vector<8x16xf32>
    %cst_42 = arith.constant 0.353553385 : f32
    %86 = vector.broadcast %cst_42 : f32 to vector<8x16xf32>
    %87 = arith.mulf %85, %86 : vector<8x16xf32>
    %88 = arith.addf %87, %16 : vector<8x16xf32>
    %cst_43 = arith.constant dense<0xFF800000> : vector<8xf32>
    %89 = vector.multi_reduction <maximumf>, %88, %cst_43 [1] : vector<8x16xf32> to vector<8xf32>
    %90 = vector.shape_cast %89 : vector<8xf32> to vector<8x1xf32>
    %91 = vector.broadcast %90 : vector<8x1xf32> to vector<8x16xf32>
    %92 = arith.subf %88, %91 : vector<8x16xf32>
    %93 = math.exp %92 : vector<8x16xf32>
    %cst_44 = arith.constant dense<0.000000e+00> : vector<8xf32>
    %94 = vector.multi_reduction <add>, %93, %cst_44 [1] : vector<8x16xf32> to vector<8xf32>
    %95 = vector.shape_cast %94 : vector<8xf32> to vector<8x1xf32>
    %96 = tpu.reciprocal %95 : vector<8x1xf32> -> vector<8x1xf32>
    %97 = vector.broadcast %96 : vector<8x1xf32> to vector<8x16xf32>
    %98 = arith.mulf %93, %97 : vector<8x16xf32>
    %c0_45 = arith.constant 0 : index
    %c3 = arith.constant 3 : index
    %c0_46 = arith.constant 0 : index
    %c0_47 = arith.constant 0 : index
    %99 = vector.load %arg14[%c0_45, %c3, %c0_46, %c0_47] : memref<1x4x8x16xf32, #tpu.memory_space<vmem>>, vector<1x1x8x16xf32>
    %100 = vector.shape_cast %99 : vector<1x1x8x16xf32> to vector<8x16xf32>
    %101 = vector.shape_cast %98 : vector<8x16xf32> to vector<1x1x8x16xf32>
    tpu.vector_store %arg14[%c0_45, %c3, %c0_46, %c0_47], %101 {strides = array<i32>} : memref<1x4x8x16xf32, #tpu.memory_space<vmem>>, vector<1x1x8x16xf32>,
    %cst_48 = arith.constant dense<0.000000e+00> : vector<8x8xf32>
    %102 = tpu.matmul %98, %84, %cst_48 {dimension_numbers = #tpu.dot_dimension_numbers<[1], [0], [0], [1], [0, 0, 1, 1], [], []>} : vector<8x16xf32>, vector<16x8xf32>, vector<8x8xf32> -> vector<8x8xf32>
    %103 = tpu.concatenate %39, %60, %81, %102 in 1 : vector<8x8xf32>, vector<8x8xf32>, vector<8x8xf32>, vector<8x8xf32> -> vector<8x32xf32>
    %cst_49 = arith.constant dense<0.000000e+00> : vector<8x32xf32>
    %104 = tpu.matmul %103, %17, %cst_49 {dimension_numbers = #tpu.dot_dimension_numbers<[1], [0], [0], [1], [0, 0, 1, 1], [], []>} : vector<8x32xf32>, vector<32x32xf32>, vector<8x32xf32> -> vector<8x32xf32>
    %105 = vector.broadcast %18 : vector<1x32xf32> to vector<8x32xf32>
    %106 = arith.addf %104, %105 : vector<8x32xf32>
    %107 = arith.addf %1, %106 : vector<8x32xf32>
    %c0_50 = arith.constant 0 : index
    %c0_51 = arith.constant 0 : index
    %108 = vector.load %arg11[%c0_50, %c0_51] : memref<1x32xf32, #tpu.memory_space<vmem>>, vector<1x32xf32>
    %c0_52 = arith.constant 0 : index
    %c0_53 = arith.constant 0 : index
    %109 = vector.load %arg12[%c0_52, %c0_53] : memref<1x32xf32, #tpu.memory_space<vmem>>, vector<1x32xf32>
    %cst_54 = arith.constant dense<0.000000e+00> : vector<8xf32>
    %110 = vector.multi_reduction <add>, %107, %cst_54 [1] : vector<8x32xf32> to vector<8xf32>
    %111 = vector.shape_cast %110 : vector<8xf32> to vector<8x1xf32>
    %cst_55 = arith.constant 3.200000e+01 : f32
    %112 = vector.broadcast %cst_55 : f32 to vector<8x1xf32>
    %113 = arith.divf %111, %112 : vector<8x1xf32>
    %114 = arith.mulf %107, %107 : vector<8x32xf32>
    %cst_56 = arith.constant dense<0.000000e+00> : vector<8xf32>
    %115 = vector.multi_reduction <add>, %114, %cst_56 [1] : vector<8x32xf32> to vector<8xf32>
    %116 = vector.shape_cast %115 : vector<8xf32> to vector<8x1xf32>
    %cst_57 = arith.constant 3.200000e+01 : f32
    %117 = vector.broadcast %cst_57 : f32 to vector<8x1xf32>
    %118 = arith.divf %116, %117 : vector<8x1xf32>
    %119 = arith.mulf %113, %113 : vector<8x1xf32>
    %120 = arith.subf %118, %119 : vector<8x1xf32>
    %cst_58 = arith.constant 0.000000e+00 : f32
    %121 = vector.broadcast %cst_58 : f32 to vector<8x1xf32>
    %122 = arith.maximumf %120, %121 : vector<8x1xf32>
    %123 = vector.broadcast %113 : vector<8x1xf32> to vector<8x32xf32>
    %124 = arith.subf %107, %123 : vector<8x32xf32>
    %cst_59 = arith.constant 9.99999974E-6 : f32
    %125 = vector.broadcast %cst_59 : f32 to vector<8x1xf32>
    %126 = arith.addf %122, %125 : vector<8x1xf32>
    %127 = math.rsqrt %126 : vector<8x1xf32>
    %128 = vector.broadcast %127 : vector<8x1xf32> to vector<8x32xf32>
    %129 = arith.mulf %124, %128 : vector<8x32xf32>
    %130 = vector.broadcast %108 : vector<1x32xf32> to vector<8x32xf32>
    %131 = arith.mulf %129, %130 : vector<8x32xf32>
    %132 = vector.broadcast %109 : vector<1x32xf32> to vector<8x32xf32>
    %133 = arith.addf %131, %132 : vector<8x32xf32>
    %c0_60 = arith.constant 0 : index
    %c0_61 = arith.constant 0 : index
    %c0_62 = arith.constant 0 : index
    %134 = vector.load %arg13[%c0_60, %c0_61, %c0_62] : memref<1x8x32xf32, #tpu.memory_space<vmem>>, vector<1x8x32xf32>
    %135 = vector.shape_cast %134 : vector<1x8x32xf32> to vector<8x32xf32>
    %136 = vector.shape_cast %133 : vector<8x32xf32> to vector<1x8x32xf32>
    tpu.vector_store %arg13[%c0_60, %c0_61, %c0_62], %136 {strides = array<i32>} : memref<1x8x32xf32, #tpu.memory_space<vmem>>, vector<1x8x32xf32>,
    return
  }
  func.func @transform_0(%arg0: i32, %arg1: i32) -> (i32, i32, i32) {
    %c0_i32 = arith.constant 0 : i32
    %c0_i32_0 = arith.constant 0 : i32
    return %arg0, %arg1, %c0_i32 : i32, i32, i32
  }
  func.func @transform_1(%arg0: i32, %arg1: i32) -> (i32, i32, i32) {
    %c0_i32 = arith.constant 0 : i32
    %c0_i32_0 = arith.constant 0 : i32
    %c0_i32_1 = arith.constant 0 : i32
    return %arg0, %c0_i32, %c0_i32_0 : i32, i32, i32
  }
  func.func @transform_2(%arg0: i32, %arg1: i32) -> (i32, i32, i32) {
    %c0_i32 = arith.constant 0 : i32
    %c0_i32_0 = arith.constant 0 : i32
    %c0_i32_1 = arith.constant 0 : i32
    return %arg0, %c0_i32, %c0_i32_0 : i32, i32, i32
  }
  func.func @transform_3(%arg0: i32, %arg1: i32) -> (i32, i32) {
    %c0_i32 = arith.constant 0 : i32
    %c0_i32_0 = arith.constant 0 : i32
    %c0_i32_1 = arith.constant 0 : i32
    return %c0_i32, %c0_i32_0 : i32, i32
  }
  func.func @transform_4(%arg0: i32, %arg1: i32) -> (i32, i32) {
    %c0_i32 = arith.constant 0 : i32
    %c0_i32_0 = arith.constant 0 : i32
    %c0_i32_1 = arith.constant 0 : i32
    return %c0_i32, %c0_i32_0 : i32, i32
  }
  func.func @transform_5(%arg0: i32, %arg1: i32) -> (i32, i32) {
    %c0_i32 = arith.constant 0 : i32
    %c0_i32_0 = arith.constant 0 : i32
    %c0_i32_1 = arith.constant 0 : i32
    return %c0_i32, %c0_i32_0 : i32, i32
  }
  func.func @transform_6(%arg0: i32, %arg1: i32) -> (i32, i32) {
    %c0_i32 = arith.constant 0 : i32
    %c0_i32_0 = arith.constant 0 : i32
    %c0_i32_1 = arith.constant 0 : i32
    return %c0_i32, %c0_i32_0 : i32, i32
  }
  func.func @transform_7(%arg0: i32, %arg1: i32) -> (i32, i32) {
    %c0_i32 = arith.constant 0 : i32
    %c0_i32_0 = arith.constant 0 : i32
    %c0_i32_1 = arith.constant 0 : i32
    return %c0_i32, %c0_i32_0 : i32, i32
  }
  func.func @transform_8(%arg0: i32, %arg1: i32) -> (i32, i32) {
    %c0_i32 = arith.constant 0 : i32
    %c0_i32_0 = arith.constant 0 : i32
    %c0_i32_1 = arith.constant 0 : i32
    return %c0_i32, %c0_i32_0 : i32, i32
  }
  func.func @transform_9(%arg0: i32, %arg1: i32) -> (i32, i32) {
    %c0_i32 = arith.constant 0 : i32
    %c0_i32_0 = arith.constant 0 : i32
    %c0_i32_1 = arith.constant 0 : i32
    return %c0_i32, %c0_i32_0 : i32, i32
  }
  func.func @transform_10(%arg0: i32, %arg1: i32) -> (i32, i32) {
    %c0_i32 = arith.constant 0 : i32
    %c0_i32_0 = arith.constant 0 : i32
    %c0_i32_1 = arith.constant 0 : i32
    return %c0_i32, %c0_i32_0 : i32, i32
  }
  func.func @transform_11(%arg0: i32, %arg1: i32) -> (i32, i32, i32) {
    %c0_i32 = arith.constant 0 : i32
    %c0_i32_0 = arith.constant 0 : i32
    return %arg0, %arg1, %c0_i32 : i32, i32, i32
  }
  func.func @transform_12(%arg0: i32, %arg1: i32) -> (i32, i32, i32, i32) {
    %c0_i32 = arith.constant 0 : i32
    %c0_i32_0 = arith.constant 0 : i32
    %c0_i32_1 = arith.constant 0 : i32
    return %arg0, %c0_i32, %arg1, %c0_i32_0 : i32, i32, i32, i32
  }
}

module attributes {stable_mosaic.version = 11 : i64} {
  func.func @_self_attn_ln_kernel(%arg0: i32, %arg1: memref<1x8x32xf32, #tpu.memory_space<vmem>>, %arg2: memref<1x1x8xf32, #tpu.memory_space<vmem>>, %arg3: memref<32x96xf32, #tpu.memory_space<vmem>>, %arg4: memref<1x96xf32, #tpu.memory_space<vmem>>, %arg5: memref<32x32xf32, #tpu.memory_space<vmem>>, %arg6: memref<1x32xf32, #tpu.memory_space<vmem>>, %arg7: memref<1x32xf32, #tpu.memory_space<vmem>>, %arg8: memref<1x32xf32, #tpu.memory_space<vmem>>, %arg9: memref<1x8x32xf32, #tpu.memory_space<vmem>>) attributes {dimension_semantics = [#tpu.dimension_semantics<parallel>], iteration_bounds = array<i64: 2>, scalar_prefetch = 0 : i64, scratch_operands = 0 : i64, tpu.core_type = #tpu.core_type<tc>, window_params = [{transform_indices = @transform_0, window_bounds = array<i64: 1, 8, 32>}, {transform_indices = @transform_1, window_bounds = array<i64: 1, 1, 8>}, {pipeline_mode = #tpu.pipeline_mode<synchronous>, transform_indices = @transform_2, window_bounds = array<i64: 32, 96>}, {pipeline_mode = #tpu.pipeline_mode<synchronous>, transform_indices = @transform_3, window_bounds = array<i64: 1, 96>}, {pipeline_mode = #tpu.pipeline_mode<synchronous>, transform_indices = @transform_4, window_bounds = array<i64: 32, 32>}, {pipeline_mode = #tpu.pipeline_mode<synchronous>, transform_indices = @transform_5, window_bounds = array<i64: 1, 32>}, {pipeline_mode = #tpu.pipeline_mode<synchronous>, transform_indices = @transform_6, window_bounds = array<i64: 1, 32>}, {pipeline_mode = #tpu.pipeline_mode<synchronous>, transform_indices = @transform_7, window_bounds = array<i64: 1, 32>}, {transform_indices = @transform_8, window_bounds = array<i64: 1, 8, 32>}]} {
    %c0 = arith.constant 0 : index
    %c0_0 = arith.constant 0 : index
    %c0_1 = arith.constant 0 : index
    %0 = vector.load %arg1[%c0, %c0_0, %c0_1] : memref<1x8x32xf32, #tpu.memory_space<vmem>>, vector<1x8x32xf32>
    %1 = vector.shape_cast %0 : vector<1x8x32xf32> to vector<8x32xf32>
    %c0_2 = arith.constant 0 : index
    %c0_3 = arith.constant 0 : index
    %2 = vector.load %arg3[%c0_2, %c0_3] : memref<32x96xf32, #tpu.memory_space<vmem>>, vector<32x96xf32>
    %cst = arith.constant dense<0.000000e+00> : vector<8x96xf32>
    %3 = tpu.matmul %1, %2, %cst {dimension_numbers = #tpu.dot_dimension_numbers<[1], [0], [0], [1], [0, 0, 1, 1], [], []>} : vector<8x32xf32>, vector<32x96xf32>, vector<8x96xf32> -> vector<8x96xf32>
    %c0_4 = arith.constant 0 : index
    %c0_5 = arith.constant 0 : index
    %4 = vector.load %arg4[%c0_4, %c0_5] : memref<1x96xf32, #tpu.memory_space<vmem>>, vector<1x96xf32>
    %5 = vector.broadcast %4 : vector<1x96xf32> to vector<8x96xf32>
    %6 = arith.addf %3, %5 : vector<8x96xf32>
    %7 = vector.extract_strided_slice %6 {offsets = [0, 0], sizes = [8, 32], strides = [1, 1]} : vector<8x96xf32> to vector<8x32xf32>
    %8 = vector.extract_strided_slice %6 {offsets = [0, 32], sizes = [8, 32], strides = [1, 1]} : vector<8x96xf32> to vector<8x32xf32>
    %9 = vector.extract_strided_slice %6 {offsets = [0, 64], sizes = [8, 32], strides = [1, 1]} : vector<8x96xf32> to vector<8x32xf32>
    %c0_6 = arith.constant 0 : index
    %c0_7 = arith.constant 0 : index
    %c0_8 = arith.constant 0 : index
    %10 = vector.load %arg2[%c0_6, %c0_7, %c0_8] : memref<1x1x8xf32, #tpu.memory_space<vmem>>, vector<1x1x8xf32>
    %11 = vector.shape_cast %10 : vector<1x1x8xf32> to vector<1x8xf32>
    %12 = vector.shape_cast %11 : vector<1x8xf32> to vector<1x8xf32>
    %13 = vector.broadcast %12 : vector<1x8xf32> to vector<8x8xf32>
    %14 = tpu.iota {dimensions = array<i32: 0>} : vector<8x8xi32>
    %15 = tpu.iota {dimensions = array<i32: 1>} : vector<8x8xi32>
    %16 = arith.cmpi sge, %14, %15 : vector<8x8xi32>
    %cst_9 = arith.constant -1.000000e+10 : f32
    %17 = vector.broadcast %cst_9 : f32 to vector<8x8xf32>
    %18 = arith.select %16, %13, %17 : vector<8x8xi1>, vector<8x8xf32>
    %c0_10 = arith.constant 0 : index
    %c0_11 = arith.constant 0 : index
    %19 = vector.load %arg5[%c0_10, %c0_11] : memref<32x32xf32, #tpu.memory_space<vmem>>, vector<32x32xf32>
    %c0_12 = arith.constant 0 : index
    %c0_13 = arith.constant 0 : index
    %20 = vector.load %arg6[%c0_12, %c0_13] : memref<1x32xf32, #tpu.memory_space<vmem>>, vector<1x32xf32>
    %21 = vector.extract_strided_slice %7 {offsets = [0, 0], sizes = [8, 8], strides = [1, 1]} : vector<8x32xf32> to vector<8x8xf32>
    %22 = vector.extract_strided_slice %8 {offsets = [0, 0], sizes = [8, 8], strides = [1, 1]} : vector<8x32xf32> to vector<8x8xf32>
    %23 = vector.extract_strided_slice %9 {offsets = [0, 0], sizes = [8, 8], strides = [1, 1]} : vector<8x32xf32> to vector<8x8xf32>
    %cst_14 = arith.constant dense<0.000000e+00> : vector<8x8xf32>
    %24 = tpu.matmul %21, %22, %cst_14 {dimension_numbers = #tpu.dot_dimension_numbers<[1], [1], [0], [0], [0, 0, 1, 0], [], []>} : vector<8x8xf32>, vector<8x8xf32>, vector<8x8xf32> -> vector<8x8xf32>
    %cst_15 = arith.constant 0.353553385 : f32
    %25 = vector.broadcast %cst_15 : f32 to vector<8x8xf32>
    %26 = arith.mulf %24, %25 : vector<8x8xf32>
    %27 = arith.addf %26, %18 : vector<8x8xf32>
    %cst_16 = arith.constant dense<0xFF800000> : vector<8xf32>
    %28 = vector.multi_reduction <maximumf>, %27, %cst_16 [1] : vector<8x8xf32> to vector<8xf32>
    %29 = vector.shape_cast %28 : vector<8xf32> to vector<8x1xf32>
    %30 = vector.broadcast %29 : vector<8x1xf32> to vector<8x8xf32>
    %31 = arith.subf %27, %30 : vector<8x8xf32>
    %32 = math.exp %31 : vector<8x8xf32>
    %cst_17 = arith.constant dense<0.000000e+00> : vector<8xf32>
    %33 = vector.multi_reduction <add>, %32, %cst_17 [1] : vector<8x8xf32> to vector<8xf32>
    %34 = vector.shape_cast %33 : vector<8xf32> to vector<8x1xf32>
    %35 = tpu.reciprocal %34 : vector<8x1xf32> -> vector<8x1xf32>
    %36 = vector.broadcast %35 : vector<8x1xf32> to vector<8x8xf32>
    %37 = arith.mulf %32, %36 : vector<8x8xf32>
    %cst_18 = arith.constant dense<0.000000e+00> : vector<8x8xf32>
    %38 = tpu.matmul %37, %23, %cst_18 {dimension_numbers = #tpu.dot_dimension_numbers<[1], [0], [0], [1], [0, 0, 1, 1], [], []>} : vector<8x8xf32>, vector<8x8xf32>, vector<8x8xf32> -> vector<8x8xf32>
    %39 = vector.extract_strided_slice %7 {offsets = [0, 8], sizes = [8, 8], strides = [1, 1]} : vector<8x32xf32> to vector<8x8xf32>
    %40 = vector.extract_strided_slice %8 {offsets = [0, 8], sizes = [8, 8], strides = [1, 1]} : vector<8x32xf32> to vector<8x8xf32>
    %41 = vector.extract_strided_slice %9 {offsets = [0, 8], sizes = [8, 8], strides = [1, 1]} : vector<8x32xf32> to vector<8x8xf32>
    %cst_19 = arith.constant dense<0.000000e+00> : vector<8x8xf32>
    %42 = tpu.matmul %39, %40, %cst_19 {dimension_numbers = #tpu.dot_dimension_numbers<[1], [1], [0], [0], [0, 0, 1, 0], [], []>} : vector<8x8xf32>, vector<8x8xf32>, vector<8x8xf32> -> vector<8x8xf32>
    %cst_20 = arith.constant 0.353553385 : f32
    %43 = vector.broadcast %cst_20 : f32 to vector<8x8xf32>
    %44 = arith.mulf %42, %43 : vector<8x8xf32>
    %45 = arith.addf %44, %18 : vector<8x8xf32>
    %cst_21 = arith.constant dense<0xFF800000> : vector<8xf32>
    %46 = vector.multi_reduction <maximumf>, %45, %cst_21 [1] : vector<8x8xf32> to vector<8xf32>
    %47 = vector.shape_cast %46 : vector<8xf32> to vector<8x1xf32>
    %48 = vector.broadcast %47 : vector<8x1xf32> to vector<8x8xf32>
    %49 = arith.subf %45, %48 : vector<8x8xf32>
    %50 = math.exp %49 : vector<8x8xf32>
    %cst_22 = arith.constant dense<0.000000e+00> : vector<8xf32>
    %51 = vector.multi_reduction <add>, %50, %cst_22 [1] : vector<8x8xf32> to vector<8xf32>
    %52 = vector.shape_cast %51 : vector<8xf32> to vector<8x1xf32>
    %53 = tpu.reciprocal %52 : vector<8x1xf32> -> vector<8x1xf32>
    %54 = vector.broadcast %53 : vector<8x1xf32> to vector<8x8xf32>
    %55 = arith.mulf %50, %54 : vector<8x8xf32>
    %cst_23 = arith.constant dense<0.000000e+00> : vector<8x8xf32>
    %56 = tpu.matmul %55, %41, %cst_23 {dimension_numbers = #tpu.dot_dimension_numbers<[1], [0], [0], [1], [0, 0, 1, 1], [], []>} : vector<8x8xf32>, vector<8x8xf32>, vector<8x8xf32> -> vector<8x8xf32>
    %57 = vector.extract_strided_slice %7 {offsets = [0, 16], sizes = [8, 8], strides = [1, 1]} : vector<8x32xf32> to vector<8x8xf32>
    %58 = vector.extract_strided_slice %8 {offsets = [0, 16], sizes = [8, 8], strides = [1, 1]} : vector<8x32xf32> to vector<8x8xf32>
    %59 = vector.extract_strided_slice %9 {offsets = [0, 16], sizes = [8, 8], strides = [1, 1]} : vector<8x32xf32> to vector<8x8xf32>
    %cst_24 = arith.constant dense<0.000000e+00> : vector<8x8xf32>
    %60 = tpu.matmul %57, %58, %cst_24 {dimension_numbers = #tpu.dot_dimension_numbers<[1], [1], [0], [0], [0, 0, 1, 0], [], []>} : vector<8x8xf32>, vector<8x8xf32>, vector<8x8xf32> -> vector<8x8xf32>
    %cst_25 = arith.constant 0.353553385 : f32
    %61 = vector.broadcast %cst_25 : f32 to vector<8x8xf32>
    %62 = arith.mulf %60, %61 : vector<8x8xf32>
    %63 = arith.addf %62, %18 : vector<8x8xf32>
    %cst_26 = arith.constant dense<0xFF800000> : vector<8xf32>
    %64 = vector.multi_reduction <maximumf>, %63, %cst_26 [1] : vector<8x8xf32> to vector<8xf32>
    %65 = vector.shape_cast %64 : vector<8xf32> to vector<8x1xf32>
    %66 = vector.broadcast %65 : vector<8x1xf32> to vector<8x8xf32>
    %67 = arith.subf %63, %66 : vector<8x8xf32>
    %68 = math.exp %67 : vector<8x8xf32>
    %cst_27 = arith.constant dense<0.000000e+00> : vector<8xf32>
    %69 = vector.multi_reduction <add>, %68, %cst_27 [1] : vector<8x8xf32> to vector<8xf32>
    %70 = vector.shape_cast %69 : vector<8xf32> to vector<8x1xf32>
    %71 = tpu.reciprocal %70 : vector<8x1xf32> -> vector<8x1xf32>
    %72 = vector.broadcast %71 : vector<8x1xf32> to vector<8x8xf32>
    %73 = arith.mulf %68, %72 : vector<8x8xf32>
    %cst_28 = arith.constant dense<0.000000e+00> : vector<8x8xf32>
    %74 = tpu.matmul %73, %59, %cst_28 {dimension_numbers = #tpu.dot_dimension_numbers<[1], [0], [0], [1], [0, 0, 1, 1], [], []>} : vector<8x8xf32>, vector<8x8xf32>, vector<8x8xf32> -> vector<8x8xf32>
    %75 = vector.extract_strided_slice %7 {offsets = [0, 24], sizes = [8, 8], strides = [1, 1]} : vector<8x32xf32> to vector<8x8xf32>
    %76 = vector.extract_strided_slice %8 {offsets = [0, 24], sizes = [8, 8], strides = [1, 1]} : vector<8x32xf32> to vector<8x8xf32>
    %77 = vector.extract_strided_slice %9 {offsets = [0, 24], sizes = [8, 8], strides = [1, 1]} : vector<8x32xf32> to vector<8x8xf32>
    %cst_29 = arith.constant dense<0.000000e+00> : vector<8x8xf32>
    %78 = tpu.matmul %75, %76, %cst_29 {dimension_numbers = #tpu.dot_dimension_numbers<[1], [1], [0], [0], [0, 0, 1, 0], [], []>} : vector<8x8xf32>, vector<8x8xf32>, vector<8x8xf32> -> vector<8x8xf32>
    %cst_30 = arith.constant 0.353553385 : f32
    %79 = vector.broadcast %cst_30 : f32 to vector<8x8xf32>
    %80 = arith.mulf %78, %79 : vector<8x8xf32>
    %81 = arith.addf %80, %18 : vector<8x8xf32>
    %cst_31 = arith.constant dense<0xFF800000> : vector<8xf32>
    %82 = vector.multi_reduction <maximumf>, %81, %cst_31 [1] : vector<8x8xf32> to vector<8xf32>
    %83 = vector.shape_cast %82 : vector<8xf32> to vector<8x1xf32>
    %84 = vector.broadcast %83 : vector<8x1xf32> to vector<8x8xf32>
    %85 = arith.subf %81, %84 : vector<8x8xf32>
    %86 = math.exp %85 : vector<8x8xf32>
    %cst_32 = arith.constant dense<0.000000e+00> : vector<8xf32>
    %87 = vector.multi_reduction <add>, %86, %cst_32 [1] : vector<8x8xf32> to vector<8xf32>
    %88 = vector.shape_cast %87 : vector<8xf32> to vector<8x1xf32>
    %89 = tpu.reciprocal %88 : vector<8x1xf32> -> vector<8x1xf32>
    %90 = vector.broadcast %89 : vector<8x1xf32> to vector<8x8xf32>
    %91 = arith.mulf %86, %90 : vector<8x8xf32>
    %cst_33 = arith.constant dense<0.000000e+00> : vector<8x8xf32>
    %92 = tpu.matmul %91, %77, %cst_33 {dimension_numbers = #tpu.dot_dimension_numbers<[1], [0], [0], [1], [0, 0, 1, 1], [], []>} : vector<8x8xf32>, vector<8x8xf32>, vector<8x8xf32> -> vector<8x8xf32>
    %93 = tpu.concatenate %38, %56, %74, %92 in 1 : vector<8x8xf32>, vector<8x8xf32>, vector<8x8xf32>, vector<8x8xf32> -> vector<8x32xf32>
    %cst_34 = arith.constant dense<0.000000e+00> : vector<8x32xf32>
    %94 = tpu.matmul %93, %19, %cst_34 {dimension_numbers = #tpu.dot_dimension_numbers<[1], [0], [0], [1], [0, 0, 1, 1], [], []>} : vector<8x32xf32>, vector<32x32xf32>, vector<8x32xf32> -> vector<8x32xf32>
    %95 = vector.broadcast %20 : vector<1x32xf32> to vector<8x32xf32>
    %96 = arith.addf %94, %95 : vector<8x32xf32>
    %97 = arith.addf %1, %96 : vector<8x32xf32>
    %c0_35 = arith.constant 0 : index
    %c0_36 = arith.constant 0 : index
    %98 = vector.load %arg7[%c0_35, %c0_36] : memref<1x32xf32, #tpu.memory_space<vmem>>, vector<1x32xf32>
    %c0_37 = arith.constant 0 : index
    %c0_38 = arith.constant 0 : index
    %99 = vector.load %arg8[%c0_37, %c0_38] : memref<1x32xf32, #tpu.memory_space<vmem>>, vector<1x32xf32>
    %cst_39 = arith.constant dense<0.000000e+00> : vector<8xf32>
    %100 = vector.multi_reduction <add>, %97, %cst_39 [1] : vector<8x32xf32> to vector<8xf32>
    %101 = vector.shape_cast %100 : vector<8xf32> to vector<8x1xf32>
    %cst_40 = arith.constant 3.200000e+01 : f32
    %102 = vector.broadcast %cst_40 : f32 to vector<8x1xf32>
    %103 = arith.divf %101, %102 : vector<8x1xf32>
    %104 = arith.mulf %97, %97 : vector<8x32xf32>
    %cst_41 = arith.constant dense<0.000000e+00> : vector<8xf32>
    %105 = vector.multi_reduction <add>, %104, %cst_41 [1] : vector<8x32xf32> to vector<8xf32>
    %106 = vector.shape_cast %105 : vector<8xf32> to vector<8x1xf32>
    %cst_42 = arith.constant 3.200000e+01 : f32
    %107 = vector.broadcast %cst_42 : f32 to vector<8x1xf32>
    %108 = arith.divf %106, %107 : vector<8x1xf32>
    %109 = arith.mulf %103, %103 : vector<8x1xf32>
    %110 = arith.subf %108, %109 : vector<8x1xf32>
    %cst_43 = arith.constant 0.000000e+00 : f32
    %111 = vector.broadcast %cst_43 : f32 to vector<8x1xf32>
    %112 = arith.maximumf %110, %111 : vector<8x1xf32>
    %113 = vector.broadcast %103 : vector<8x1xf32> to vector<8x32xf32>
    %114 = arith.subf %97, %113 : vector<8x32xf32>
    %cst_44 = arith.constant 9.99999974E-6 : f32
    %115 = vector.broadcast %cst_44 : f32 to vector<8x1xf32>
    %116 = arith.addf %112, %115 : vector<8x1xf32>
    %117 = math.rsqrt %116 : vector<8x1xf32>
    %118 = vector.broadcast %117 : vector<8x1xf32> to vector<8x32xf32>
    %119 = arith.mulf %114, %118 : vector<8x32xf32>
    %120 = vector.broadcast %98 : vector<1x32xf32> to vector<8x32xf32>
    %121 = arith.mulf %119, %120 : vector<8x32xf32>
    %122 = vector.broadcast %99 : vector<1x32xf32> to vector<8x32xf32>
    %123 = arith.addf %121, %122 : vector<8x32xf32>
    %c0_45 = arith.constant 0 : index
    %c0_46 = arith.constant 0 : index
    %c0_47 = arith.constant 0 : index
    %124 = vector.load %arg9[%c0_45, %c0_46, %c0_47] : memref<1x8x32xf32, #tpu.memory_space<vmem>>, vector<1x8x32xf32>
    %125 = vector.shape_cast %124 : vector<1x8x32xf32> to vector<8x32xf32>
    %126 = vector.shape_cast %123 : vector<8x32xf32> to vector<1x8x32xf32>
    tpu.vector_store %arg9[%c0_45, %c0_46, %c0_47], %126 {strides = array<i32>} : memref<1x8x32xf32, #tpu.memory_space<vmem>>, vector<1x8x32xf32>,
    return
  }
  func.func @transform_0(%arg0: i32) -> (i32, i32, i32) {
    %c0_i32 = arith.constant 0 : i32
    %c0_i32_0 = arith.constant 0 : i32
    %c0_i32_1 = arith.constant 0 : i32
    return %arg0, %c0_i32, %c0_i32_0 : i32, i32, i32
  }
  func.func @transform_1(%arg0: i32) -> (i32, i32, i32) {
    %c0_i32 = arith.constant 0 : i32
    %c0_i32_0 = arith.constant 0 : i32
    %c0_i32_1 = arith.constant 0 : i32
    return %arg0, %c0_i32, %c0_i32_0 : i32, i32, i32
  }
  func.func @transform_2(%arg0: i32) -> (i32, i32) {
    %c0_i32 = arith.constant 0 : i32
    %c0_i32_0 = arith.constant 0 : i32
    %c0_i32_1 = arith.constant 0 : i32
    return %c0_i32, %c0_i32_0 : i32, i32
  }
  func.func @transform_3(%arg0: i32) -> (i32, i32) {
    %c0_i32 = arith.constant 0 : i32
    %c0_i32_0 = arith.constant 0 : i32
    %c0_i32_1 = arith.constant 0 : i32
    return %c0_i32, %c0_i32_0 : i32, i32
  }
  func.func @transform_4(%arg0: i32) -> (i32, i32) {
    %c0_i32 = arith.constant 0 : i32
    %c0_i32_0 = arith.constant 0 : i32
    %c0_i32_1 = arith.constant 0 : i32
    return %c0_i32, %c0_i32_0 : i32, i32
  }
  func.func @transform_5(%arg0: i32) -> (i32, i32) {
    %c0_i32 = arith.constant 0 : i32
    %c0_i32_0 = arith.constant 0 : i32
    %c0_i32_1 = arith.constant 0 : i32
    return %c0_i32, %c0_i32_0 : i32, i32
  }
  func.func @transform_6(%arg0: i32) -> (i32, i32) {
    %c0_i32 = arith.constant 0 : i32
    %c0_i32_0 = arith.constant 0 : i32
    %c0_i32_1 = arith.constant 0 : i32
    return %c0_i32, %c0_i32_0 : i32, i32
  }
  func.func @transform_7(%arg0: i32) -> (i32, i32) {
    %c0_i32 = arith.constant 0 : i32
    %c0_i32_0 = arith.constant 0 : i32
    %c0_i32_1 = arith.constant 0 : i32
    return %c0_i32, %c0_i32_0 : i32, i32
  }
  func.func @transform_8(%arg0: i32) -> (i32, i32, i32) {
    %c0_i32 = arith.constant 0 : i32
    %c0_i32_0 = arith.constant 0 : i32
    %c0_i32_1 = arith.constant 0 : i32
    return %arg0, %c0_i32, %c0_i32_0 : i32, i32, i32
  }
}

module attributes {stable_mosaic.version = 11 : i64} {
  func.func @_ffn_ln_kernel(%arg0: i32, %arg1: memref<16x32xf32, #tpu.memory_space<vmem>>, %arg2: memref<32x64xf32, #tpu.memory_space<vmem>>, %arg3: memref<1x64xf32, #tpu.memory_space<vmem>>, %arg4: memref<64x32xf32, #tpu.memory_space<vmem>>, %arg5: memref<1x32xf32, #tpu.memory_space<vmem>>, %arg6: memref<1x32xf32, #tpu.memory_space<vmem>>, %arg7: memref<1x32xf32, #tpu.memory_space<vmem>>, %arg8: memref<16x32xf32, #tpu.memory_space<vmem>>) attributes {dimension_semantics = [#tpu.dimension_semantics<parallel>], iteration_bounds = array<i64: 1>, scalar_prefetch = 0 : i64, scratch_operands = 0 : i64, tpu.core_type = #tpu.core_type<tc>, window_params = [{transform_indices = @transform_0, window_bounds = array<i64: 16, 32>}, {pipeline_mode = #tpu.pipeline_mode<synchronous>, transform_indices = @transform_1, window_bounds = array<i64: 32, 64>}, {pipeline_mode = #tpu.pipeline_mode<synchronous>, transform_indices = @transform_2, window_bounds = array<i64: 1, 64>}, {pipeline_mode = #tpu.pipeline_mode<synchronous>, transform_indices = @transform_3, window_bounds = array<i64: 64, 32>}, {pipeline_mode = #tpu.pipeline_mode<synchronous>, transform_indices = @transform_4, window_bounds = array<i64: 1, 32>}, {pipeline_mode = #tpu.pipeline_mode<synchronous>, transform_indices = @transform_5, window_bounds = array<i64: 1, 32>}, {pipeline_mode = #tpu.pipeline_mode<synchronous>, transform_indices = @transform_6, window_bounds = array<i64: 1, 32>}, {transform_indices = @transform_7, window_bounds = array<i64: 16, 32>}]} {
    %c0 = arith.constant 0 : index
    %c0_0 = arith.constant 0 : index
    %0 = vector.load %arg1[%c0, %c0_0] : memref<16x32xf32, #tpu.memory_space<vmem>>, vector<16x32xf32>
    %c0_1 = arith.constant 0 : index
    %c0_2 = arith.constant 0 : index
    %1 = vector.load %arg2[%c0_1, %c0_2] : memref<32x64xf32, #tpu.memory_space<vmem>>, vector<32x64xf32>
    %cst = arith.constant dense<0.000000e+00> : vector<16x64xf32>
    %2 = tpu.matmul %0, %1, %cst {dimension_numbers = #tpu.dot_dimension_numbers<[1], [0], [0], [1], [0, 0, 1, 1], [], []>} : vector<16x32xf32>, vector<32x64xf32>, vector<16x64xf32> -> vector<16x64xf32>
    %c0_3 = arith.constant 0 : index
    %c0_4 = arith.constant 0 : index
    %3 = vector.load %arg3[%c0_3, %c0_4] : memref<1x64xf32, #tpu.memory_space<vmem>>, vector<1x64xf32>
    %4 = vector.broadcast %3 : vector<1x64xf32> to vector<16x64xf32>
    %5 = arith.addf %2, %4 : vector<16x64xf32>
    %cst_5 = arith.constant 0.000000e+00 : f32
    %6 = vector.broadcast %cst_5 : f32 to vector<16x64xf32>
    %7 = arith.maximumf %5, %6 : vector<16x64xf32>
    %c0_6 = arith.constant 0 : index
    %c0_7 = arith.constant 0 : index
    %8 = vector.load %arg4[%c0_6, %c0_7] : memref<64x32xf32, #tpu.memory_space<vmem>>, vector<64x32xf32>
    %cst_8 = arith.constant dense<0.000000e+00> : vector<16x32xf32>
    %9 = tpu.matmul %7, %8, %cst_8 {dimension_numbers = #tpu.dot_dimension_numbers<[1], [0], [0], [1], [0, 0, 1, 1], [], []>} : vector<16x64xf32>, vector<64x32xf32>, vector<16x32xf32> -> vector<16x32xf32>
    %c0_9 = arith.constant 0 : index
    %c0_10 = arith.constant 0 : index
    %10 = vector.load %arg5[%c0_9, %c0_10] : memref<1x32xf32, #tpu.memory_space<vmem>>, vector<1x32xf32>
    %11 = vector.broadcast %10 : vector<1x32xf32> to vector<16x32xf32>
    %12 = arith.addf %9, %11 : vector<16x32xf32>
    %13 = arith.addf %0, %12 : vector<16x32xf32>
    %c0_11 = arith.constant 0 : index
    %c0_12 = arith.constant 0 : index
    %14 = vector.load %arg6[%c0_11, %c0_12] : memref<1x32xf32, #tpu.memory_space<vmem>>, vector<1x32xf32>
    %c0_13 = arith.constant 0 : index
    %c0_14 = arith.constant 0 : index
    %15 = vector.load %arg7[%c0_13, %c0_14] : memref<1x32xf32, #tpu.memory_space<vmem>>, vector<1x32xf32>
    %cst_15 = arith.constant dense<0.000000e+00> : vector<16xf32>
    %16 = vector.multi_reduction <add>, %13, %cst_15 [1] : vector<16x32xf32> to vector<16xf32>
    %17 = vector.shape_cast %16 : vector<16xf32> to vector<16x1xf32>
    %cst_16 = arith.constant 3.200000e+01 : f32
    %18 = vector.broadcast %cst_16 : f32 to vector<16x1xf32>
    %19 = arith.divf %17, %18 : vector<16x1xf32>
    %20 = arith.mulf %13, %13 : vector<16x32xf32>
    %cst_17 = arith.constant dense<0.000000e+00> : vector<16xf32>
    %21 = vector.multi_reduction <add>, %20, %cst_17 [1] : vector<16x32xf32> to vector<16xf32>
    %22 = vector.shape_cast %21 : vector<16xf32> to vector<16x1xf32>
    %cst_18 = arith.constant 3.200000e+01 : f32
    %23 = vector.broadcast %cst_18 : f32 to vector<16x1xf32>
    %24 = arith.divf %22, %23 : vector<16x1xf32>
    %25 = arith.mulf %19, %19 : vector<16x1xf32>
    %26 = arith.subf %24, %25 : vector<16x1xf32>
    %cst_19 = arith.constant 0.000000e+00 : f32
    %27 = vector.broadcast %cst_19 : f32 to vector<16x1xf32>
    %28 = arith.maximumf %26, %27 : vector<16x1xf32>
    %29 = vector.broadcast %19 : vector<16x1xf32> to vector<16x32xf32>
    %30 = arith.subf %13, %29 : vector<16x32xf32>
    %cst_20 = arith.constant 9.99999974E-6 : f32
    %31 = vector.broadcast %cst_20 : f32 to vector<16x1xf32>
    %32 = arith.addf %28, %31 : vector<16x1xf32>
    %33 = math.rsqrt %32 : vector<16x1xf32>
    %34 = vector.broadcast %33 : vector<16x1xf32> to vector<16x32xf32>
    %35 = arith.mulf %30, %34 : vector<16x32xf32>
    %36 = vector.broadcast %14 : vector<1x32xf32> to vector<16x32xf32>
    %37 = arith.mulf %35, %36 : vector<16x32xf32>
    %38 = vector.broadcast %15 : vector<1x32xf32> to vector<16x32xf32>
    %39 = arith.addf %37, %38 : vector<16x32xf32>
    %c0_21 = arith.constant 0 : index
    %c0_22 = arith.constant 0 : index
    %40 = vector.load %arg8[%c0_21, %c0_22] : memref<16x32xf32, #tpu.memory_space<vmem>>, vector<16x32xf32>
    tpu.vector_store %arg8[%c0_21, %c0_22], %39 {strides = array<i32>} : memref<16x32xf32, #tpu.memory_space<vmem>>, vector<16x32xf32>,
    return
  }
  func.func @transform_0(%arg0: i32) -> (i32, i32) {
    %c0_i32 = arith.constant 0 : i32
    %c0_i32_0 = arith.constant 0 : i32
    return %arg0, %c0_i32 : i32, i32
  }
  func.func @transform_1(%arg0: i32) -> (i32, i32) {
    %c0_i32 = arith.constant 0 : i32
    %c0_i32_0 = arith.constant 0 : i32
    %c0_i32_1 = arith.constant 0 : i32
    return %c0_i32, %c0_i32_0 : i32, i32
  }
  func.func @transform_2(%arg0: i32) -> (i32, i32) {
    %c0_i32 = arith.constant 0 : i32
    %c0_i32_0 = arith.constant 0 : i32
    %c0_i32_1 = arith.constant 0 : i32
    return %c0_i32, %c0_i32_0 : i32, i32
  }
  func.func @transform_3(%arg0: i32) -> (i32, i32) {
    %c0_i32 = arith.constant 0 : i32
    %c0_i32_0 = arith.constant 0 : i32
    %c0_i32_1 = arith.constant 0 : i32
    return %c0_i32, %c0_i32_0 : i32, i32
  }
  func.func @transform_4(%arg0: i32) -> (i32, i32) {
    %c0_i32 = arith.constant 0 : i32
    %c0_i32_0 = arith.constant 0 : i32
    %c0_i32_1 = arith.constant 0 : i32
    return %c0_i32, %c0_i32_0 : i32, i32
  }
  func.func @transform_5(%arg0: i32) -> (i32, i32) {
    %c0_i32 = arith.constant 0 : i32
    %c0_i32_0 = arith.constant 0 : i32
    %c0_i32_1 = arith.constant 0 : i32
    return %c0_i32, %c0_i32_0 : i32, i32
  }
  func.func @transform_6(%arg0: i32) -> (i32, i32) {
    %c0_i32 = arith.constant 0 : i32
    %c0_i32_0 = arith.constant 0 : i32
    %c0_i32_1 = arith.constant 0 : i32
    return %c0_i32, %c0_i32_0 : i32, i32
  }
  func.func @transform_7(%arg0: i32) -> (i32, i32) {
    %c0_i32 = arith.constant 0 : i32
    %c0_i32_0 = arith.constant 0 : i32
    return %arg0, %c0_i32 : i32, i32
  }
}

</mosaic_0001>

<bundles_post_ra>
// kernel: decoder_layer.3
= control target key start
LH: loop header
LB: loop body
LE: loop exit
PB: predicated region body
PF: predicated region fallthrough
CT: control target
= control target key end

     0   :  { %13 = vsyncpa [#allocation3], 0  ;;  %s1433_s0 = inlined_call_operand.hbm [shape: f32[2,8,32], index: 0, kind: input, shape index: {}]   ;;  %s1434_s1 = inlined_call_operand.vmem [shape: f32[2,1,8], index: 1, kind: input, shape index: {}]   ;;  %s1435_s2 = inlined_call_operand.hbm [shape: f32[32,96], index: 2, kind: input, shape index: {}]   ;;  %s1436_s3 = inlined_call_operand.vmem [shape: f32[1,96], index: 3, kind: input, shape index: {}]   ;;  %s1437_s4 = inlined_call_operand.hbm [shape: f32[32,32], index: 4, kind: input, shape index: {}]   ;;  %s1438_s5 = inlined_call_operand.vmem [shape: f32[1,32], index: 5, kind: input, shape index: {}]   ;;  %s1439_s6 = inlined_call_operand.vmem [shape: f32[1,32], index: 6, kind: input, shape index: {}]   ;;  %s1440_s7 = inlined_call_operand.vmem [shape: f32[1,32], index: 7, kind: input, shape index: {}]   ;;  %s1441_s8 = inlined_call_operand.vmem [shape: f32[2,8,32], index: 8, kind: output, shape index: {}]  }
   0x1   :  { %15 = vsyncpa [#allocation3 + $0x1], 0 }
   0x2   :  { %16 = vsyncpa [#allocation5], 0  ;;  %s1242_s27 = smov 0   ;;  %s1244_s28 = smov 0  }
   0x3   :  { %s1246_s29 = smov 0   ;;  %s1248_s30 = smov 0  }
   0x4 LB: > { %s242_s11 = sshll.u32 %s1435_s2, 4  ;;  %s1266_s12 = sadd.s32 4294967295, %s1176_s30   ;;  %s1176_s30 = sphi %s1248_s30, %s1448_s30   ;;  %s1172_s29 = sphi %s1246_s29, %s1447_s29   ;;  %s1168_s28 = sphi %s1244_s28, %s1446_s28   ;;  %s1164_s27 = sphi %s1242_s27, %s1445_s27   ;;  %s243_s11 = int_to_ptr.hbm [resolvable:$true] %s242_s11 }
   0x5   : > { %p919_p0 = scmp.ge.s32.totalorder %s1176_s30, 1  ;;  %p43_p1 = scmp.eq.s32.totalorder %s1266_s12, 0 }
   0x6   : > { %p231_p2 = scmp.lt.s32.totalorder %s1176_s30, 3  ;;  %s1178_s14 = smov [#allocation4]  }
   0x7   : > { %s244_s15 = sshll.u32 %s1178_s14, 4  ;;  %s259_s18 = sshll.u32 %s1437_s4, 4  ;;  %s245_s15 = int_to_ptr.vmem [resolvable:$true] %s244_s15  ;;  %s260_s18 = int_to_ptr.hbm [resolvable:$true] %s259_s18 }
   0x8   : > { %p1271_p3 = pnand %p919_p0, %p231_p2  ;;  %s1179_s19 = smov [#allocation6]  }
   0x9   : > { %s261_s20 = sshll.u32 %s1179_s19, 4  ;;  %s1180_s21 = smov 128   ;;  %s262_s20 = int_to_ptr.vmem [resolvable:$true] %s261_s20 }
   0xa   : > { %p956_p4 = pneg %p1271_p3  ;;  %s1181_s22 = smov 8  }
   0xb   : > { %s1283_s23 = sadd.s32 1, %s1176_s30   ;;  %s29_s25 = sadd.s32 1, %s1172_s29 }
   0xc   : > { %p957_p5 = pnand %p956_p4, %p43_p1  ;;  %s26_s24 = ssub.s32 %s1176_s30, %s1283_s23 }
   0xd   : > { %p27_p6 = scmp.eq.s32.totalorder %s26_s24, 0  ;;  %p36_p7 = scmp.ne.s32.totalorder %s1172_s29, %s1168_s28 }
   0xe   : > { %959 = dma.hbm_to_vmem [thread:$0]  (!%p957_p5), %s243_s11, 512, %s245_s15, [#allocation5], %s1180_s21, %s1180_s21, %s1181_s22  }
   0xf   : > { %962 = dma.hbm_to_vmem [thread:$0]  (!%p957_p5), %s260_s18, 512, %s262_s20, [#allocation5], %s1180_s21, %s1180_s21, %s1181_s22  }
  0x10   : > { %p37_p8 = scmp.eq.s32.totalorder %s1176_s30, 0  ;;  %p42_p9 = scmp.ne.s32.totalorder %s1168_s28, %s1164_s27 }
  0x11   : > { %s1294_s26 = scalar_select %p27_p6, %s1172_s29, %s29_s25  }
  0x12   : > { %p1298_p10 = por %p43_p1, %p42_p9  ;;  %p969_p11 = scmp.lt.s32.totalorder %s1176_s30, 2 }
  0x13   : > { %s284_s10 = sand.u32 1, %s1172_s29   ;;  %s924_s11 = sshll.u32 %s1176_s30, 3 }
  0x14   : > { %p38_p12 = por %p37_p8, %p36_p7  ;;  %s923_s14 = sshll.u32 %s284_s10, 3 }
  0x15   : > { %s292_s17 = scalar_lea.hbm %s1433_s0, %s924_s11  ;;  %s288_s19 = scalar_lea.vmem [#allocation2], %s923_s14 }
  0x16   : > { %s294_s18 = sshll.u32 %s292_s17, 4  ;;  %s296_s20 = sshll.u32 %s288_s19, 4  ;;  %s295_s18 = int_to_ptr.hbm [resolvable:$true] %s294_s18  ;;  %s297_s20 = int_to_ptr.vmem [resolvable:$true] %s296_s20 }
  0x17   : > { %p1308_p13 = pnand %p969_p11, %p38_p12  ;;  %s285_s21 = scalar_lea.sflag [#allocation3], %s284_s10 }
  0x18   : > { %s1108_s22 = sshra.s32 %s295_s18, 4  ;;  %s1115_s11 = scalar_lea.hbm %s1433_s0, 16  ;;  %s1109_s22 = int_to_ptr.hbm [resolvable:$true] %s1108_s22 }
  0x19   : > { %s1110_s30 = scalar_lea.hbm %s1109_s22, 8  ;;  %p1112_p2 = pneg %p1308_p13 }
  0x1a   : > { %p1111_p0 = scmp.ne.s32.totalorder %s1109_s22, %s1110_s30  ;;  %p1116_p6 = scmp.lt.s32.totalorder %s1109_s22, %s1433_s0 }
  0x1b   : > { %p1117_p7 = scmp.lt.s32.totalorder %s1115_s11, %s1110_s30 }
  0x1c   : > { %p1113_p4 = pnand %p1112_p2, %p1111_p0 }
  0x1d   : > { %p1118_p8 = por %p1117_p7, %p1116_p6 }
  0x1e   : > { %p1114_p5 = pneg %p1113_p4 }
  0x20   : > { %p1119_p9 = pnand %p1118_p8, %p1114_p5 }
  0x22   : > { %1122 = shalt.err (!%p1119_p9)
}
  0x23   : > { %966 = dma.hbm_to_vmem [thread:$0]  (!%p1308_p13), %s295_s18, 128, %s297_s20, %s285_s21  }
  0x24   : > { %311 = sbr.rel (%p1271_p3) target bundleno = 1252 (0x4e4), region = 52  ;;  %s313_s10 = sand.u32 (!%p1271_p3), 1, %s1168_s28  }
  0x25   : > { %s926_s16 = sshll.u32 (!%p1271_p3), %s313_s10, 3  ;;  %s314_s17 = scalar_lea.sflag (!%p1271_p3), [#allocation3], %s313_s10 }
  0x26   : > { %s317_s19 = scalar_lea.vmem (!%p1271_p3), [#allocation2], %s926_s16 }
  0x29   : > { %1155 = dma.done.wait (%p1298_p10), %s314_s17, 128  }
  0x2a   : > { %1157 = vsyncadd (%p1298_p10), %s314_s17, 4294967168 }
  0x2b   : > { %1159 = dma.done.wait (%p43_p1), [#allocation5], 1024  }
  0x2c   : > { %1161 = vsyncadd (%p43_p1), [#allocation5], 4294966272  ;;  %v374_v0 = vld [vmem:[#allocation4 + $0x18] sm:$0xff]  ;;  %v373_v1 = vld [vmem:[#allocation4 + $0x10] sm:$0xff]  ;;  %vm379_vm0 = vcmask 261120   ;;  %s1182_s18 = smov 72   ;;  %v407_v15 = vlaneseq }
  0x2d   : > { %395 = vmatpush.msra.mxu0 %v374_v0  ;;  %v372_v2 = vld [vmem:[#allocation4 + $0x8] sm:$0xff]  ;;  %v371_v3 = vld [vmem:[#allocation4] sm:$0xff]  ;;  %v1333_v4 = vld [vmem:[%s317_s19] sm:$0xff]  ;;  %s1183_s20 = smov 120   ;;  %s1184_s27 = smov 96   ;;  %vm421_vm1 = vcmask 64512  }
  0x2e   : > { %v1023_v5 = vld [vmem:[%s1436_s3] ss:$0 sm:$0xff]  ;;  %s1185_s21 = smov 112   ;;  %s1186_s22 = smov 80   ;;  %v408_v16 = vshrl.u32 %v407_v15, 7  ;;  %v410_v17 = vand.u32 127, %v407_v15 }
  0x2f   : > { %396 = vmatpush.msra.mxu0 %v373_v1  ;;  %s1187_s30 = smov 88   ;;  %s1188_s24 = smov 104  }
  0x30   : > { %p363_p1 = scmp.lt.s32.totalorder %s1266_s12, 1  ;;  %vm411_vm2 = vcmp.ge.s32.totalorder %v408_v16, %v410_v17  ;;  %s1189_s15 = smov 56  }
  0x31   : > { %397 = vmatpush.msra.mxu0 %v372_v2  ;;  %s1190_s10 = smov 40   ;;  %s1191_s16 = smov 64  }
  0x32   : > { %s1450_s12 = smov (!%p363_p1, %s1266_s12), 1  ;;  %s1192_s17 = smov 48  }
  0x33   : > { %398 = vmatpush.msra.mxu0 %v371_v3  ;;  %s365_s14 = scalar_lea.vmem %s1434_s1, %s1450_s12  ;;  %s1193_s19 = smov 8  }
  0x34   : > { %930 = vmatmul.msk.f32.vlgmr.msra.gmra.mxu0 %vm379_vm0, %v1333_v4  ;;  %v1024_v18 = vld [vmem:[%s365_s14] ss:$0 sm:$0xff]  ;;  %s1194_s13 = smov 24   ;;  %s1195_s9 = smov 16  }
  0x35   : > { %v412_v20 = vsel %vm411_vm2, %v1024_v18, -1e+10 }
  0xb1   : > { %v400_v6 = vpop.f32.mrf.mxu0 }
  0xb2   : > { %v1340_v7 = vadd.f32 %v1023_v5, %v400_v6 }
  0xb4   : > { %660 = vrot.lane.b32.xlu2 %v1340_v7, %s1182_s18  ;;  %498 = vrot.lane.b32.xlu1 %v1340_v7, %s1183_s20 }
  0xb5   : > { %419 = vrot.lane.b32.xlu0 %v1340_v7, %s1184_s27 }
  0xbc   : > { %578 = vrot.lane.b32.xlu2 %v1340_v7, %s1185_s21  ;;  %580 = vrot.lane.b32.xlu1 %v1340_v7, %s1186_s22  ;;  %s929_s22 = sshll.u32 %s1450_s12, 3 }
  0xbd   : > { %500 = vrot.lane.b32.xlu0 %v1340_v7, %s1187_s30  ;;  %s369_s14 = scalar_lea.vmem %s1441_s8, %s929_s22 }
  0xc5   : > { %658 = vrot.lane.b32.xlu0 %v1340_v7, %s1188_s24 }
 0x10e   : > { %v661_v8 = vpop.permute.xlu2 %660 }
 0x10f   : > { %940 = vmatpush.xpose.msk.msrb.mxu0 %vm421_vm1, %v661_v8 }
 0x116   : > { %v579_v13 = vpop.permute.xlu2 %578 }
 0x126   : > { %v499_v9 = vpop.permute.xlu1 %498 }
 0x127   : > { %v420_v10 = vpop.permute.xlu0 %419 }
 0x128   : > { %931 = vmatpush.xpose.msk.msra.mxu1 %vm421_vm1, %v420_v10 }
 0x12b   : > { %932 = vmatmul.msk.f32.vlgmr.msra.gmra.mxu1 %vm421_vm1, %v1340_v7 }
 0x12e   : > { %v581_v11 = vpop.permute.xlu1 %580 }
 0x12f   : > { %v501_v12 = vpop.permute.xlu0 %500  ;;  %937 = vmatpush.xpose.msk.msrb.mxu1 %vm421_vm1, %v581_v11 }
 0x130   : > { %934 = vmatpush.xpose.msk.msra.mxu3 %vm421_vm1, %v501_v12 }
 0x133   : > { %935 = vmatmul.msk.f32.vlgmr.msra.gmra.mxu3 %vm421_vm1, %v499_v9  ;;  %938 = vmatmul.msk.f32.vlgmr.msrb.gmra.mxu1 %vm421_vm1, %v579_v13 }
 0x137   : > { %v659_v14 = vpop.permute.xlu0 %658 }
 0x138   : > { %941 = vmatmul.msk.f32.vlgmr.msrb.gmra.mxu0 %vm421_vm1, %v659_v14 }
 0x1a8   : > { %v443_v19 = vpop.f32.mrf.mxu1 }
 0x1a9   : > { %v446_v21 = vmul.f32 0.35355338, %v443_v19 }
 0x1ab   : > { %v447_v22 = vadd.f32 %v446_v21, %v412_v20 }
 0x1ad   : > { %v448_v23 = vsel %vm421_vm1, %v447_v22, -inf }
 0x1ae   : > { %449 = vmax.xlane.f32.xlu1 %v448_v23 }
 0x1b0   : > { %v603_v24 = vpop.f32.mrf.mxu1 }
 0x1b1   : > { %v606_v25 = vmul.f32 0.35355338, %v603_v24 }
 0x1b3   : > { %v607_v26 = vadd.f32 %v606_v25, %v412_v20 }
 0x1b5   : > { %v608_v27 = vsel %vm421_vm1, %v607_v26, -inf  ;;  %v683_v30 = vpop.f32.mrf.mxu0 }
 0x1b6   : > { %609 = vmax.xlane.f32.xlu0 %v608_v27  ;;  %v523_v28 = vpop.f32.mrf.mxu3  ;;  %v686_v32 = vmul.f32 0.35355338, %v683_v30 }
 0x1b7   : > { %v526_v29 = vmul.f32 0.35355338, %v523_v28 }
 0x1b8   : > { %v687_v34 = vadd.f32 %v686_v32, %v412_v20 }
 0x1b9   : > { %v527_v31 = vadd.f32 %v526_v29, %v412_v20 }
 0x1ba   : > { %v688_v35 = vsel %vm421_vm1, %v687_v34, -inf }
 0x1bb   : > { %v528_v33 = vsel %vm421_vm1, %v527_v31, -inf }
 0x1bc   : > { %529 = vmax.xlane.f32.xlu2 %v528_v33 }
 0x1c4   : > { %689 = vmax.xlane.f32.xlu2 %v688_v35 }
 0x1ca   : > { %552 = vrot.lane.b32.xlu0 %v1340_v7, %s1189_s15 }
 0x221   : > { %v450_v36 = vpop.xlane.xlu1 %449 }
 0x222   : > { %v451_v37 = vsub.f32 %v447_v22, %v450_v36 }
 0x224   : > { %v452_v38 = vmul.f32 1.442695, %v451_v37 }
 0x226   : > { %1028 = vpow2.f32 %v452_v38 }
 0x229   : > { %v610_v39 = vpop.xlane.xlu0 %609 }
 0x22a   : > { %v611_v40 = vsub.f32 %v607_v26, %v610_v39 }
 0x22c   : > { %v1029_v41 = vpop.eup %1028  ;;  %v612_v42 = vmul.f32 1.442695, %v611_v40 }
 0x22d   : > { %v454_v43 = vsel %vm421_vm1, %v1029_v41, 0.0 }
 0x22e   : > { %1030 = vpow2.f32 %v612_v42  ;;  %455 = vadd.xlane.f32.xlu1 %v454_v43 }
 0x22f   : > { %v530_v44 = vpop.xlane.xlu2 %529 }
 0x230   : > { %v531_v45 = vsub.f32 %v527_v31, %v530_v44 }
 0x232   : > { %v532_v46 = vmul.f32 1.442695, %v531_v45 }
 0x234   : > { %v1372_v47 = vpop.eup %1030  ;;  %1032 = vpow2.f32 %v532_v46 }
 0x235   : > { %v614_v48 = vsel %vm421_vm1, %v1372_v47, 0.0 }
 0x236   : > { %615 = vadd.xlane.f32.xlu0 %v614_v48 }
 0x237   : > { %v690_v49 = vpop.xlane.xlu2 %689 }
 0x238   : > { %v691_v50 = vsub.f32 %v687_v34, %v690_v49 }
 0x23a   : > { %v1376_v51 = vpop.eup %1032  ;;  %v692_v52 = vmul.f32 1.442695, %v691_v50  ;;  %v416_v50 = vld [vmem:[#allocation6 + $0x18] sm:$0xff] }
 0x23b   : > { %v534_v53 = vsel %vm421_vm1, %v1376_v51, 0.0  ;;  %773 = vmatpush.msra.mxu1 %v416_v50 }
 0x23c   : > { %1034 = vpow2.f32 %v692_v52  ;;  %535 = vadd.xlane.f32.xlu2 %v534_v53  ;;  %v553_v57 = vpop.permute.xlu0 %552  ;;  %v414_v52 = vld [vmem:[#allocation6 + $0x8] sm:$0xff] }
 0x242   : > { %v1380_v54 = vpop.eup %1034 }
 0x243   : > { %v694_v55 = vsel %vm421_vm1, %v1380_v54, 0.0 }
 0x244   : > { %695 = vadd.xlane.f32.xlu1 %v694_v55 }
 0x24a   : > { %712 = vrot.lane.b32.xlu0 %v1340_v7, %s1190_s10 }
 0x254   : > { %472 = vrot.lane.b32.xlu2 %v1340_v7, %s1191_s16 }
 0x25d   : > { %632 = vrot.lane.b32.xlu1 %v1340_v7, %s1192_s17 }
 0x2a1   : > { %v456_v56 = vpop.xlane.xlu1 %455 }
 0x2a2   : > { %1036 = vrcp.f32 %v456_v56  ;;  %v468_v63 = vand.u32 2147483648, %v456_v56  ;;  %vm462_vm4 = vweird.f32 %v456_v56  ;;  %v466_v2 = vand.u32 2147483647, %v456_v56 }
 0x2a4   : > { %v469_v5 = vor.u32 1.1754944e-38, %v468_v63  ;;  %vm467_vm6 = vcmp.eq.f32.partialorder %v466_v2, 8.507059e+37  ;;  %v1196_v2 = vmov 32.0  }
 0x2a8   : > { %v1037_v58 = vpop.eup %1036 }
 0x2a9   : > { %v458_v59 = vmul.f32 %v1037_v58, %v456_v56  ;;  %v1387_v61 = vpop.xlane.xlu0 %615  ;;  %vm463_vm3 = vweird.f32 %v1037_v58 }
 0x2aa   : > { %1038 = vrcp.f32 %v1387_v61  ;;  %vm464_vm5 = vmor %vm462_vm4, %vm463_vm3  ;;  %v628_v34 = vand.u32 2147483648, %v1387_v61  ;;  %vm622_vm15 = vweird.f32 %v1387_v61  ;;  %v626_v36 = vand.u32 2147483647, %v1387_v61 }
 0x2ab   : > { %v459_v60 = vsub.f32 1.0, %v458_v59  ;;  %v1025_v59 = vld [vmem:[%s1438_s5] ss:$0 sm:$0xff] }
 0x2ac   : > { %vm627_vm4 = vcmp.eq.f32.partialorder %v626_v36, 8.507059e+37 }
 0x2ad   : > { %v460_v62 = vmul.f32 %v1037_v58, %v459_v60 }
 0x2af   : > { %v536_v0 = vpop.xlane.xlu2 %535  ;;  %v461_v1 = vadd.f32 %v1037_v58, %v460_v62 }
 0x2b0   : > { %1040 = vrcp.f32 %v536_v0  ;;  %v1039_v7 = vpop.eup %1038  ;;  %v548_v15 = vand.u32 2147483648, %v536_v0  ;;  %v546_v17 = vand.u32 2147483647, %v536_v0  ;;  %vm542_vm8 = vweird.f32 %v536_v0 }
 0x2b1   : > { %v465_v3 = vsel %vm464_vm5, %v1037_v58, %v461_v1  ;;  %v618_v13 = vmul.f32 %v1039_v7, %v1387_v61  ;;  %vm623_vm12 = vweird.f32 %v1039_v7  ;;  %vm751_vm5 = vcmask 130048  }
 0x2b2   : > { %v470_v6 = vsel %vm467_vm6, %v469_v5, %v465_v3  ;;  %v549_v22 = vor.u32 1.1754944e-38, %v548_v15  ;;  %vm547_vm10 = vcmp.eq.f32.partialorder %v546_v17, 8.507059e+37  ;;  %vm624_vm3 = vmor %vm622_vm15, %vm623_vm12  ;;  %vm753_vm6 = vcmask 195584  }
 0x2b3   : > { %v471_v12 = vmul.f32 %v1029_v41, %v470_v6  ;;  %v619_v19 = vsub.f32 1.0, %v618_v13  ;;  %v629_v41 = vor.u32 1.1754944e-38, %v628_v34 }
 0x2b5   : > { %v620_v26 = vmul.f32 %v1039_v7, %v619_v19 }
 0x2b6   : > { %v1041_v8 = vpop.eup %1040 }
 0x2b7   : > { %v538_v9 = vmul.f32 %v1041_v8, %v536_v0  ;;  %v696_v10 = vpop.xlane.xlu1 %695  ;;  %v473_v11 = vpop.permute.xlu2 %472  ;;  %vm543_vm7 = vweird.f32 %v1041_v8  ;;  %v621_v32 = vadd.f32 %v1039_v7, %v620_v26  ;;  %v1027_v26 = vld [vmem:[%s1440_s7] ss:$0 sm:$0xff] }
 0x2b8   : > { %1042 = vrcp.f32 %v696_v10  ;;  %493 = vmatpush.msra.mxu2 %v473_v11  ;;  %vm544_vm9 = vmor %vm542_vm8, %vm543_vm7  ;;  %v708_v29 = vand.u32 2147483648, %v696_v10  ;;  %v706_v31 = vand.u32 2147483647, %v696_v10  ;;  %vm702_vm13 = vweird.f32 %v696_v10 }
 0x2b9   : > { %v539_v14 = vsub.f32 1.0, %v538_v9  ;;  %933 = vmatmul.msk.f32.vlgmr.msra.gmra.mxu2 %vm421_vm1, %v471_v12  ;;  %v625_v40 = vsel %vm624_vm3, %v1039_v7, %v621_v32  ;;  %1044 = vrcp.f32 %v1196_v2 }
 0x2ba   : > { %573 = vmatpush.msrb.mxu2 %v553_v57  ;;  %v709_v35 = vor.u32 1.1754944e-38, %v708_v29  ;;  %vm707_vm2 = vcmp.eq.f32.partialorder %v706_v31, 8.507059e+37  ;;  %v630_v42 = vsel %vm627_vm4, %v629_v41, %v625_v40 }
 0x2bb   : > { %v540_v16 = vmul.f32 %v1041_v8, %v539_v14  ;;  %v631_v44 = vmul.f32 %v1372_v47, %v630_v42  ;;  %v413_v47 = vld [vmem:[#allocation6] sm:$0xff] }
 0x2bc   : > { %v713_v18 = vpop.permute.xlu0 %712 }
 0x2bd   : > { %v541_v20 = vadd.f32 %v1041_v8, %v540_v16  ;;  %733 = vmatpush.msra.mxu2 %v713_v18 }
 0x2be   : > { %v1043_v21 = vpop.eup %1042 }
 0x2bf   : > { %v698_v23 = vmul.f32 %v1043_v21, %v696_v10  ;;  %v545_v24 = vsel %vm544_vm9, %v1041_v8, %v541_v20  ;;  %vm703_vm11 = vweird.f32 %v1043_v21  ;;  %v1045_v3 = vpop.eup %1044 }
 0x2c0   : > { %v550_v25 = vsel %vm547_vm10, %v549_v22, %v545_v24  ;;  %vm704_vm14 = vmor %vm702_vm13, %vm703_vm11  ;;  %v788_v5 = vmul.f32 32.0, %v1045_v3  ;;  %v1026_v24 = vld [vmem:[%s1439_s6] ss:$0 sm:$0xff] }
 0x2c1   : > { %v699_v27 = vsub.f32 1.0, %v698_v23  ;;  %v551_v28 = vmul.f32 %v1376_v51, %v550_v25  ;;  %v415_v51 = vld [vmem:[#allocation6 + $0x10] sm:$0xff] }
 0x2c2   : > { %774 = vmatpush.msra.mxu1 %v415_v51  ;;  %v789_v6 = vsub.f32 1.0, %v788_v5 }
 0x2c3   : > { %v700_v30 = vmul.f32 %v1043_v21, %v699_v27  ;;  %936 = vmatmul.msk.f32.vlgmr.msrb.gmra.mxu2 %vm421_vm1, %v551_v28 }
 0x2c4   : > { %775 = vmatpush.msra.mxu1 %v414_v52  ;;  %v790_v7 = vmul.f32 %v1045_v3, %v789_v6 }
 0x2c5   : > { %v701_v33 = vadd.f32 %v1043_v21, %v700_v30 }
 0x2c6   : > { %776 = vmatpush.msra.mxu1 %v413_v47  ;;  %v791_v8 = vadd.f32 %v1045_v3, %v790_v7 }
 0x2c7   : > { %v705_v37 = vsel %vm704_vm14, %v1043_v21, %v701_v33 }
 0x2c8   : > { %v710_v38 = vsel %vm707_vm2, %v709_v35, %v705_v37 }
 0x2c9   : > { %v711_v39 = vmul.f32 %v1380_v54, %v710_v38 }
 0x2cb   : > { %942 = vmatmul.msk.f32.vlgmr.msra.gmra.mxu2 %vm421_vm1, %v711_v39 }
 0x2cf   : > { %v633_v43 = vpop.permute.xlu1 %632 }
 0x2d0   : > { %653 = vmatpush.msrb.mxu3 %v633_v43 }
 0x2d1   : > { %939 = vmatmul.msk.f32.vlgmr.msrb.gmra.mxu3 %vm421_vm1, %v631_v44 }
 0x33c   : > { %v495_v45 = vpop.f32.mrf.mxu2 }
 0x346   : > { %v575_v46 = vpop.f32.mrf.mxu2 }
 0x347   : > { %739 = vrot.lane.b32.xlu2 %v575_v46, %s1193_s19 }
 0x34e   : > { %v735_v48 = vpop.f32.mrf.mxu2 }
 0x34f   : > { %747 = vrot.lane.b32.xlu0 %v735_v48, %s1194_s13 }
 0x354   : > { %v655_v49 = vpop.f32.mrf.mxu3 }
 0x355   : > { %743 = vrot.lane.b32.xlu1 %v655_v49, %s1195_s9 }
 0x3a1   : > { %v740_v53 = vpop.permute.xlu2 %739 }
 0x3a2   : > { %v750_v54 = vsel %vm421_vm1, %v495_v45, %v740_v53  ;;  %vm792_vm1 = vweird.f32 %v1045_v3 }
 0x3a3   : > { %v793_v9 = vsel %vm792_vm1, %v1045_v3, %v791_v8 }
 0x3c1   : > { %v748_v56 = vpop.permute.xlu0 %747 }
 0x3c7   : > { %v744_v55 = vpop.permute.xlu1 %743 }
 0x3c8   : > { %v752_v57 = vsel %vm751_vm5, %v750_v54, %v744_v55 }
 0x3c9   : > { %v754_v58 = vsel %vm753_vm6, %v752_v57, %v748_v56 }
 0x3ca   : > { %943 = vmatmul.msk.f32.vlgmr.msra.gmra.mxu1 %vm379_vm0, %v754_v58 }
 0x447   : > { %v778_v60 = vpop.f32.mrf.mxu1 }
 0x448   : > { %v779_v61 = vadd.f32 %v1025_v59, %v778_v60 }
 0x44a   : > { %v781_v62 = vadd.f32 %v779_v61, %v1333_v4 }
 0x44c   : > { %v784_v63 = vsel %vm379_vm0, %v781_v62, 0.0  ;;  %v795_v0 = vmul.f32 %v781_v62, %v781_v62 }
 0x44d   : > { %785 = vadd.xlane.f32.xlu2 %v784_v63 }
 0x44e   : > { %v796_v1 = vsel %vm379_vm0, %v795_v0, 0.0 }
 0x44f   : > { %797 = vadd.xlane.f32.xlu1 %v796_v1 }
 0x4c0   : > { %v786_v10 = vpop.xlane.xlu2 %785 }
 0x4c1   : > { %v794_v11 = vmul.f32 %v793_v9, %v786_v10 }
 0x4c2   : > { %v798_v12 = vpop.xlane.xlu1 %797 }
 0x4c3   : > { %v800_v4 = vmul.f32 %v794_v11, %v794_v11  ;;  %v799_v13 = vmul.f32 %v798_v12, %v793_v9  ;;  %v803_v23 = vsub.f32 %v781_v62, %v794_v11 }
 0x4c5   : > { %v801_v14 = vsub.f32 %v799_v13, %v800_v4 }
 0x4c7   : > { %v802_v15 = vmax.f32 %v801_v14, 0.0 }
 0x4c9   : > { %v804_v16 = vadd.f32 1e-05, %v802_v15 }
 0x4cb   : > { %1046 = vrsqrt.f32 %v804_v16  ;;  %vm811_vm8 = vweird.f32 %v804_v16 }
 0x4d1   : > { %v1047_v17 = vpop.eup %1046 }
 0x4d2   : > { %v806_v18 = vmul.f32 %v1047_v17, %v804_v16  ;;  %vm812_vm7 = vweird.f32 %v1047_v17 }
 0x4d3   : > { %vm813_vm9 = vmor %vm811_vm8, %vm812_vm7 }
 0x4d4   : > { %v807_v19 = vmul.f32 %v1047_v17, %v806_v18 }
 0x4d6   : > { %v808_v20 = vmul.f32 0.5, %v807_v19 }
 0x4d8   : > { %v809_v21 = vsub.f32 1.5, %v808_v20 }
 0x4da   : > { %v810_v22 = vmul.f32 %v1047_v17, %v809_v21 }
 0x4dc   : > { %v814_v25 = vsel %vm813_vm9, %v1047_v17, %v810_v22 }
 0x4dd   : > { %v815_v27 = vmul.f32 %v814_v25, %v803_v23 }
 0x4df   : > { %v819_v28 = vmul.f32 %v1026_v24, %v815_v27 }
 0x4e1   : > { %v823_v29 = vadd.f32 %v1027_v26, %v819_v28 }
 0x4e3   : > { %824 = vst.msk [vmem:[%s369_s14] sm:$0xff] %vm379_vm0, %v823_v29 }
 0x4e4 PF: > { %p19_p3 = scmp.ge.s32.totalorder %s1283_s23, 4   ;;  %s1445_s27 = smov %s1168_s28 }
 0x4e5   : > { %s1446_s28 = smov %s1172_s29  ;;  %s1447_s29 = smov %s1294_s26 }
 0x4e6   : > { %s1448_s30 = smov %s1283_s23  ;;  %21 = sbr.rel (!%p19_p3) target bundleno = 4 (0x4), region = 103 }
 0x4eb   :  { %844 = vsyncpa [#allocation3], 1 }
 0x4ec   :  { %846 = vsyncpa [#allocation3 + $0x1], 1 }
 0x4ed   :  { %847 = vsyncpa [#allocation5], 1 }

// kernel: decoder_layer.4
= control target key start
LH: loop header
LB: loop body
LE: loop exit
PB: predicated region body
PF: predicated region fallthrough
CT: control target
= control target key end

     0   :  { %s2076_s0 = inlined_call_operand.vmem [shape: f32[2,8,32], index: 0, kind: input, shape index: {}]   ;;  %s2077_s1 = inlined_call_operand.hbm [shape: f32[2,16,32], index: 1, kind: input, shape index: {}]   ;;  %s2078_s2 = inlined_call_operand.vmem [shape: f32[2,1,16], index: 2, kind: input, shape index: {}]   ;;  %s2079_s3 = inlined_call_operand.hbm [shape: f32[32,32], index: 3, kind: input, shape index: {}]   ;;  %s2080_s4 = inlined_call_operand.vmem [shape: f32[1,32], index: 4, kind: input, shape index: {}]   ;;  %s2081_s5 = inlined_call_operand.hbm [shape: f32[32,64], index: 5, kind: input, shape index: {}]   ;;  %s2082_s6 = inlined_call_operand.vmem [shape: f32[1,64], index: 6, kind: input, shape index: {}]   ;;  %s2083_s7 = inlined_call_operand.hbm [shape: f32[32,32], index: 7, kind: input, shape index: {}]   ;;  %s2084_s8 = inlined_call_operand.vmem [shape: f32[1,32], index: 8, kind: input, shape index: {}]   ;;  %s2085_s9 = inlined_call_operand.vmem [shape: f32[1,32], index: 9, kind: input, shape index: {}]   ;;  %s2086_s10 = inlined_call_operand.vmem [shape: f32[1,32], index: 10, kind: input, shape index: {}]   ;;  %s2087_s11 = inlined_call_operand.vmem [shape: f32[2,8,32], index: 11, kind: output, shape index: {0}]   ;;  %s2088_s12 = inlined_call_operand.hbm [shape: f32[2,4,8,16], index: 12, kind: output, shape index: {1}]  }
   0x1   :  { %2096 = sst [smem:[#allocation20_spill]] %s2079_s3 }
   0x2   :  { %2097 = sst [smem:[#allocation21_spill]] %s2081_s5 }
   0x3   :  { %2098 = sst [smem:[#allocation22_spill]] %s2083_s7 }
   0x4   :  { %2099 = sst [smem:[#allocation23_spill]] %s2085_s9 }
   0x5   :  { %2100 = sst [smem:[#allocation24_spill]] %s2086_s10 }
   0x6   :  { %2101 = sst [smem:[#allocation25_spill]] %s2087_s11 }
   0x7   :  { %18 = vsyncpa [#allocation4], 0 }
   0x8   :  { %20 = vsyncpa [#allocation4 + $0x1], 0 }
   0x9   :  { %21 = vsyncpa [#allocation7], 0 }
   0xa   :  { %22 = vsyncpa [#allocation10], 0 }
   0xb   :  { %23 = vsyncpa [#allocation5], 0 }
   0xc   :  { %25 = vsyncpa [#allocation5 + $0x1], 0  ;;  %s1779_s21 = smov 0   ;;  %s1781_s22 = smov 0  }
   0xd   :  { %s1783_s23 = smov 0   ;;  %s1785_s24 = smov 0  }
   0xe   :  { %s1787_s25 = smov 0   ;;  %s1789_s26 = smov 0  }
   0xf LB: > { %2102 = sst [smem:[#allocation16_spill]] %s1675_s21  ;;  %s1284_s27 = sadd.s32 4294967295, %s1695_s26   ;;  %s1695_s26 = sphi %s1789_s26, %s31_s26   ;;  %s1691_s25 = sphi %s1787_s25, %s2130_s25   ;;  %s1687_s24 = sphi %s1785_s24, %s2129_s24   ;;  %s1683_s23 = sphi %s1783_s23, %s2128_s23   ;;  %s1679_s22 = sphi %s1781_s22, %s2127_s22   ;;  %s1675_s21 = sphi %s1779_s21, %s2126_s21  }
  0x10   : > { %2103 = sst [smem:[#allocation17_spill]] %s1695_s26  ;;  %s1285_s28 = sadd.s32 4294967294, %s1695_s26  }
  0x11   : > { %p91_p0 = scmp.ne.s32.totalorder %s1679_s22, %s1675_s21  ;;  %p1813_p1 = scmp.eq.s32.totalorder %s1284_s27, 0 }
  0x12   : > { %p1817_p2 = scmp.eq.s32.totalorder %s1284_s27, 1  ;;  %p345_p3 = scmp.eq.s32.totalorder %s1285_s28, 1 }
  0x13   : > { %p1823_p4 = por %p1813_p1, %p91_p0  ;;  %p1286_p5 = scmp.ge.s32.totalorder %s1695_s26, 1 }
  0x14   : > { %p1828_p6 = por %p345_p3, %p91_p0  ;;  %p352_p7 = scmp.lt.s32.totalorder %s1695_s26, 3 }
  0x15   : > { %s2109_s3 = sld [smem:[#allocation20_spill]]  ;;  %s1697_s19 = smov [#allocation6]  }
  0x16   : > { %s2107_s14 = scalar_select %p1828_p6, 1, 0 }
  0x17   : > { %p1836_p8 = pnand %p1286_p5, %p352_p7  ;;  %s365_s20 = sshll.u32 %s1697_s19, 4  ;;  %s366_s20 = int_to_ptr.vmem [resolvable:$true] %s365_s20 }
  0x18   : > { %2108 = sst [smem:[#allocation18_spill]] %s2107_s14  ;;  %p1290_p11 = scmp.ge.s32.totalorder %s1695_s26, 2 }
  0x19   : > { %p1348_p9 = pneg %p1836_p8  ;;  %s2112_s5 = sld [smem:[#allocation21_spill]] }
  0x1a   : > { %s2092_s19 = smov 8   ;;  %s1700_s14 = smov [#allocation8]  }
  0x1b   : > { %s363_s17 = sshll.u32 %s2109_s3, 4  ;;  %p1844_p10 = pnand %p1348_p9, %p1813_p1  ;;  %s364_s17 = int_to_ptr.hbm [resolvable:$true] %s363_s17 }
  0x1c   : > { %s2091_s3 = smov 128   ;;  %s382_s21 = sshll.u32 %s1700_s14, 4  ;;  %s383_s21 = int_to_ptr.vmem [resolvable:$true] %s382_s21 }
  0x1d   : > { %1351 = dma.hbm_to_vmem [thread:$0]  (!%p1844_p10), %s364_s17, 512, %s366_s20, [#allocation7], %s2091_s3, %s2091_s3, %s2092_s19  }
  0x1e   : > { %s2113_s7 = sld [smem:[#allocation22_spill]]  ;;  %s1701_s15 = smov [#allocation9]  }
  0x1f   : > { %s380_s16 = sshll.u32 %s2112_s5, 4  ;;  %s399_s5 = sshll.u32 %s1701_s15, 4  ;;  %s381_s16 = int_to_ptr.hbm [resolvable:$true] %s380_s16  ;;  %s400_s5 = int_to_ptr.vmem [resolvable:$true] %s399_s5 }
  0x20   : > { %1354 = dma.hbm_to_vmem [thread:$0]  (!%p1844_p10), %s381_s16, 512, %s383_s21, [#allocation7], %s2091_s3, %s2091_s3, %s2092_s19  }
  0x21   : > { %s43_s10 = sadd.s32 1, %s1691_s25  ;;  %s78_s11 = sadd.s32 1, %s1683_s23 }
  0x22   : > { %p45_p12 = scmp.ge.s32.totalorder %s43_s10, 2  ;;  %p85_p13 = scmp.ne.s32.totalorder %s1683_s23, %s1679_s22 }
  0x23   : > { %p86_p0 = scmp.eq.s32.totalorder %s1695_s26, 0  ;;  %p1369_p7 = scmp.lt.s32.totalorder %s1695_s26, 2 }
  0x24   : > { %s397_s28 = sshll.u32 %s2113_s7, 4  ;;  %s2132_s10 = smov (%p45_p12, %s43_s10), 0  ;;  %s398_s28 = int_to_ptr.hbm [resolvable:$true] %s397_s28 }
  0x25   : > { %1357 = dma.hbm_to_vmem [thread:$0]  (!%p1844_p10), %s398_s28, 512, %s400_s5, [#allocation10], %s2091_s3, %s2091_s3, %s2092_s19  }
  0x26   : > { %2114 = sst [smem:[#allocation19_spill]] %s2132_s10  ;;  %p1877_p3 = por %p86_p0, %p85_p13 }
  0x27   : > { %p1883_p5 = por %p1817_p2, %p85_p13  ;;  %s75_s17 = ssub.s32 %s1691_s25, %s2132_s10 }
  0x28   : > { %p76_p9 = scmp.eq.s32.totalorder %s75_s17, 0  ;;  %s432_s5 = sand.u32 1, %s1683_s23  }
  0x29   : > { %s1291_s20 = sshll.u32 %s432_s5, 4  ;;  %s1330_s16 = sshll.u32 %s1691_s25, 4 }
  0x2a   : > { %s1892_s27 = scalar_select %p76_p9, %s1683_s23, %s78_s11  }
  0x2b   : > { %s441_s3 = scalar_lea.hbm %s2077_s1, %s1330_s16  ;;  %s436_s19 = scalar_lea.vmem [#allocation3], %s1291_s20 }
  0x2c   : > { %s444_s7 = sshll.u32 %s436_s19, 4  ;;  %s442_s30 = sshll.u32 %s441_s3, 4  ;;  %s445_s7 = int_to_ptr.vmem [resolvable:$true] %s444_s7  ;;  %s443_s30 = int_to_ptr.hbm [resolvable:$true] %s442_s30 }
  0x2d   : > { %p1359_p2 = pnand %p1369_p7, %p1877_p3  ;;  %s433_s9 = scalar_lea.sflag [#allocation4], %s432_s5 }
  0x2e   : > { %s2117_s10 = smov 8   ;;  %s2118_s26 = smov 128  }
  0x2f   : > { %1361 = dma.hbm_to_vmem [thread:$0]  (!%p1359_p2), %s443_s30, 256, %s445_s7, %s433_s9, %s2118_s26, %s2118_s26, %s2117_s10  }
  0x30   : > { %462 = sbr.rel (%p1836_p8) target bundleno = 1562 (0x61a), region = 64  ;;  %s1906_s11 = sand.u32 (!%p1836_p8), 1, %s1679_s22  }
  0x31   : > { %s1295_s19 = sshll.u32 (!%p1836_p8), %s1906_s11, 4  ;;  %s465_s3 = scalar_lea.sflag (!%p1836_p8), [#allocation4], %s1906_s11 }
  0x32   : > { %s1910_s17 = scalar_lea.vmem (!%p1836_p8), [#allocation3], %s1295_s19 }
  0x35   : > { %1658 = dma.done.wait (%p1823_p4), %s465_s3, 256  }
  0x36   : > { %1660 = vsyncadd (%p1823_p4), %s465_s3, 4294967040 }
  0x37   : > { %1662 = dma.done.wait (%p1813_p1), [#allocation7], 1024  }
  0x38   : > { %1664 = vsyncadd (%p1813_p1), [#allocation7], 4294966272 }
  0x39   : > { %1666 = dma.done.wait (%p1813_p1), [#allocation10], 512  }
  0x3a   : > { %1668 = vsyncadd (%p1813_p1), [#allocation10], 4294966784  ;;  %p542_p8 = scmp.lt.s32.totalorder %s1687_s24, 1  ;;  %v569_v0 = vld [vmem:[#allocation8 + $0x18] sm:$0xff]  ;;  %v568_v1 = vld [vmem:[#allocation8 + $0x10] sm:$0xff]  ;;  %vm574_vm0 = vcmask 261120  }
  0x3b   : > { %593 = vmatpush.msra.mxu0 %v569_v0  ;;  %v567_v2 = vld [vmem:[#allocation8 + $0x8] sm:$0xff]  ;;  %v610_v3 = vld [vmem:[#allocation6 + $0x18] sm:$0xff]  ;;  %v609_v4 = vld [vmem:[#allocation6 + $0x10] sm:$0xff]  ;;  %vm604_vm1 = vcmask 523264   ;;  %vm650_vm2 = vcmask 64512   ;;  %s1702_s15 = smov 112  }
  0x3c   : > { %s1926_s7 = scalar_select %p542_p8, %s1687_s24, 1  ;;  %v566_v5 = vld [vmem:[#allocation8] sm:$0xff]  ;;  %631 = vmatpush.msra.mxu1 %v610_v3  ;;  %v608_v7 = vld [vmem:[#allocation6 + $0x8] sm:$0xff]  ;;  %v1460_v11 = vld [vmem:[%s2082_s6] ss:$0 sm:$0xff]  ;;  %vm682_vm3 = vcmask 130048  }
  0x3d   : > { %594 = vmatpush.msra.mxu0 %v568_v1  ;;  %v564_v6 = vld [vmem:[%s1910_s17] sm:$0xff]  ;;  %v565_v10 = vld [vmem:[%s1910_s17 + $0x8] sm:$0xff]  ;;  %s1703_s30 = smov 96   ;;  %s1704_s19 = smov 120  }
  0x3e   : > { %s1300_s9 = sshll.u32 %s1926_s7, 3  ;;  %s551_s29 = scalar_lea.vmem %s2078_s2, %s1926_s7  ;;  %632 = vmatpush.msra.mxu1 %v609_v4  ;;  %v607_v8 = vld [vmem:[#allocation6] sm:$0xff]  ;;  %v1461_v18 = vld [vmem:[%s2080_s4] ss:$0 sm:$0xff] }
  0x3f   : > { %s548_s21 = scalar_lea.vmem %s2076_s0, %s1300_s9  ;;  %595 = vmatpush.msra.mxu0 %v567_v2  ;;  %s1705_s3 = smov 104   ;;  %v1968_v30 = vld [vmem:[%s551_s29] ss:$0 sm:$0xff] }
  0x40   : > { %633 = vmatpush.msra.mxu1 %v608_v7  ;;  %v1939_v9 = vld [vmem:[%s548_s21] sm:$0xff]  ;;  %s1706_s13 = smov 88   ;;  %s1299_s29 = sshll.u32 %s1906_s11, 5 }
  0x41   : > { %596 = vmatpush.msra.mxu0 %v566_v5  ;;  %s1981_s18 = scalar_lea.vmem [#allocation11], %s1299_s29  ;;  %s1707_s10 = smov 80  }
  0x42   : > { %1302 = vmatmul.msk.f32.vlgmr.msra.gmra.mxu0 %vm574_vm0, %v564_v6  ;;  %634 = vmatpush.msra.mxu1 %v607_v8  ;;  %s1708_s21 = smov 72   ;;  %s1709_s5 = smov 8  }
  0x43   : > { %1304 = vmatmul.msk.f32.vlgmr.msra.gmra.mxu1 %vm574_vm0, %v1939_v9  ;;  %s1710_s20 = smov 16   ;;  %s1711_s16 = smov 24  }
  0x44   : > { %s1098_s29 = scalar_lea.sflag [#allocation5], %s1906_s11 }
  0x4a   : > { %1303 = vmatmul.msk.f32.gmra.mxu0 %vm574_vm0, %v565_v10 }
  0xbf   : > { %v598_v12 = vpop.f32.mrf.mxu0 }
  0xc0   : > { %v599_v13 = vadd.f32 %v1460_v11, %v598_v12  ;;  %v636_v20 = vpop.f32.mrf.mxu1 }
  0xc1   : > { %v637_v21 = vadd.f32 %v1461_v18, %v636_v20 }
  0xc2   : > { %605 = vst.msk [vmem:[#allocation2] sm:$0xff] %vm604_vm1, %v599_v13 }
  0xc7   : > { %v601_v14 = vpop.f32.mrf.mxu0 }
  0xc8   : > { %v602_v15 = vadd.f32 %v1460_v11, %v601_v14 }
  0xc9   : > { %v639_v17 = vld [vmem:[#allocation2] sm:$0xff] }
  0xca   : > { %606 = vst.msk [vmem:[#allocation2 + $0x8] sm:$0xff] %vm604_vm1, %v602_v15 }
  0xd1   : > { %v640_v16 = vld [vmem:[#allocation2 + $0x8] sm:$0xff] }
  0xd2   : > { %830 = vrot.lane.b32.xlu2 %v640_v16, %s1702_s15  ;;  %1305 = vmatpush.xpose.msk.msra.mxu2 %vm650_vm2, %v640_v16  ;;  %v1954_v19 = vpack.i.bf16 %v639_v17, %v640_v16 }
  0xd4   : > { %1440 = vrot.lane.b32.xlu1 %v1954_v19, %s1703_s30  ;;  %s1114_s30 = sshll.u32 %s1981_s18, 4  ;;  %s1115_s30 = int_to_ptr.vmem [resolvable:$true] %s1114_s30 }
  0xd6   : > { %1306 = vmatpush.xpose.msk.msra.mxu2 %vm650_vm2, %v639_v17 }
  0xd9   : > { %1307 = vmatmul.msk.f32.vlgmr.msra.gmra.mxu2 %vm650_vm2, %v637_v21 }
  0xda   : > { %739 = vrot.lane.b32.xlu2 %v639_v17, %s1704_s19 }
  0xdc   : > { %741 = vrot.lane.b32.xlu1 %v640_v16, %s1704_s19 }
  0xe2   : > { %826 = vrot.lane.b32.xlu2 %v637_v21, %s1702_s15 }
  0xe4   : > { %737 = vrot.lane.b32.xlu1 %v637_v21, %s1704_s19  ;;  %s1331_s19 = sshll.u32 %s1687_s24, 5 }
  0xe5   : > { %s1113_s26 = scalar_lea.hbm %s2088_s12, %s1331_s19 }
  0xea   : > { %917 = vrot.lane.b32.xlu2 %v639_v17, %s1705_s3 }
  0xec   : > { %919 = vrot.lane.b32.xlu1 %v640_v16, %s1705_s3 }
  0xf4   : > { %915 = vrot.lane.b32.xlu1 %v637_v21, %s1705_s3 }
 0x12c   : > { %v831_v22 = vpop.permute.xlu2 %830 }
 0x12d   : > { %1314 = vmatpush.xpose.msk.msrb.mxu2 %vm650_vm2, %v831_v22 }
 0x134   : > { %v740_v26 = vpop.permute.xlu2 %739 }
 0x13c   : > { %v827_v29 = vpop.permute.xlu2 %826 }
 0x144   : > { %v918_v36 = vpop.permute.xlu2 %917 }
 0x146   : > { %v1441_v23 = vpop.permute.xlu1 %1440 }
 0x147   : > { %v1442_v24 = vunpack.i.l.bf16 %v1441_v23  ;;  %v1443_v25 = vunpack.i.h.bf16 %v1441_v23 }
 0x149   : > { %731 = vmatpush.msra.mxu3 %v1442_v24 }
 0x14b   : > { %732 = vmatpush.msra.mxu3 %v1443_v25 }
 0x14e   : > { %v742_v27 = vpop.permute.xlu1 %741 }
 0x14f   : > { %1309 = vmatpush.xpose.msk.msrb.mxu3 %vm650_vm2, %v742_v27 }
 0x153   : > { %1310 = vmatpush.xpose.msk.msrb.mxu3 %vm650_vm2, %v740_v26 }
 0x156   : > { %v738_v28 = vpop.permute.xlu1 %737 }
 0x15c   : > { %v677_v31 = vpop.f32.mrf.mxu2 }
 0x15d   : > { %v680_v32 = vmul.f32 0.35355338, %v677_v31 }
 0x15e   : > { %v920_v33 = vpop.permute.xlu1 %919 }
 0x15f   : > { %1319 = vmatpush.xpose.msk.msrb.mxu0 %vm650_vm2, %v920_v33  ;;  %v681_v34 = vadd.f32 %v1968_v30, %v680_v32 }
 0x161   : > { %v683_v35 = vsel %vm682_vm3, %v681_v34, -inf }
 0x162   : > { %684 = vmax.xlane.f32.xlu0 %v683_v35 }
 0x163   : > { %1320 = vmatpush.xpose.msk.msrb.mxu0 %vm650_vm2, %v918_v36 }
 0x166   : > { %v916_v37 = vpop.permute.xlu1 %915 }
 0x167   : > { %1321 = vmatmul.msk.f32.vlgmr.msrb.gmra.mxu0 %vm650_vm2, %v916_v37 }
 0x1d5   : > { %v685_v38 = vpop.xlane.xlu0 %684 }
 0x1d6   : > { %v686_v39 = vsub.f32 %v681_v34, %v685_v38 }
 0x1d8   : > { %v687_v40 = vmul.f32 1.442695, %v686_v39 }
 0x1da   : > { %1465 = vpow2.f32 %v687_v40 }
 0x1e0   : > { %v1466_v41 = vpop.eup %1465 }
 0x1e1   : > { %v689_v42 = vsel %vm682_vm3, %v1466_v41, 0.0 }
 0x1e2   : > { %690 = vadd.xlane.f32.xlu0 %v689_v42 }
 0x1e4   : > { %v944_v43 = vpop.f32.mrf.mxu0 }
 0x1e5   : > { %v947_v44 = vmul.f32 0.35355338, %v944_v43 }
 0x1e7   : > { %v948_v45 = vadd.f32 %v1968_v30, %v947_v44 }
 0x1e9   : > { %v949_v46 = vsel %vm682_vm3, %v948_v45, -inf }
 0x1ea   : > { %950 = vmax.xlane.f32.xlu1 %v949_v46 }
 0x1f6   : > { %828 = vrot.lane.b32.xlu0 %v639_v17, %s1702_s15 }
 0x203   : > { %1445 = vrot.lane.b32.xlu1 %v1954_v19, %s1706_s13  ;;  %s1116_s13 = sshll.u32 %s1113_s26, 4  ;;  %s1117_s13 = int_to_ptr.hbm [resolvable:$true] %s1116_s13 }
 0x255   : > { %v691_v47 = vpop.xlane.xlu0 %690 }
 0x256   : > { %1467 = vrcp.f32 %v691_v47  ;;  %v703_v51 = vand.u32 2147483648, %v691_v47  ;;  %v701_v53 = vand.u32 2147483647, %v691_v47  ;;  %vm697_vm5 = vweird.f32 %v691_v47 }
 0x258   : > { %v704_v55 = vor.u32 1.1754944e-38, %v703_v51  ;;  %vm702_vm7 = vcmp.eq.f32.partialorder %v701_v53, 8.507059e+37 }
 0x25c   : > { %v1468_v48 = vpop.eup %1467 }
 0x25d   : > { %v693_v49 = vmul.f32 %v1468_v48, %v691_v47  ;;  %vm698_vm4 = vweird.f32 %v1468_v48  ;;  %v951_v60 = vpop.xlane.xlu1 %950 }
 0x25e   : > { %vm699_vm6 = vmor %vm697_vm5, %vm698_vm4  ;;  %v952_v2 = vsub.f32 %v948_v45, %v951_v60 }
 0x25f   : > { %v694_v50 = vsub.f32 1.0, %v693_v49 }
 0x260   : > { %v953_v5 = vmul.f32 1.442695, %v952_v2 }
 0x261   : > { %v695_v52 = vmul.f32 %v1468_v48, %v694_v50 }
 0x262   : > { %1469 = vpow2.f32 %v953_v5 }
 0x263   : > { %v696_v54 = vadd.f32 %v1468_v48, %v695_v52 }
 0x265   : > { %v700_v56 = vsel %vm699_vm6, %v1468_v48, %v696_v54 }
 0x266   : > { %v705_v57 = vsel %vm702_vm7, %v704_v55, %v700_v56  ;;  %vm1018_vm7 = vcmask 195584  }
 0x267   : > { %v706_v58 = vmul.f32 %v1466_v41, %v705_v57 }
 0x268   : > { %v829_v59 = vpop.permute.xlu0 %828  ;;  %v1470_v12 = vpop.eup %1469 }
 0x269   : > { %707 = vst.msk [vmem:[%s1981_s18] sm:$0xff] %vm682_vm3, %v706_v58  ;;  %1308 = vmatmul.msk.f32.vlgmr.msra.gmra.mxu3 %vm682_vm3, %v706_v58  ;;  %1315 = vmatpush.xpose.msk.msrb.mxu2 %vm650_vm2, %v829_v59  ;;  %v955_v13 = vsel %vm682_vm3, %v1470_v12, 0.0 }
 0x26c   : > { %1316 = vmatmul.msk.f32.vlgmr.msrb.gmra.mxu2 %vm650_vm2, %v827_v29 }
 0x271   : > { %1311 = vmatmul.msk.f32.vlgmr.msrb.gmra.mxu3 %vm650_vm2, %v738_v28 }
 0x275   : > { %v1446_v61 = vpop.permute.xlu1 %1445 }
 0x276   : > { %v1447_v62 = vunpack.i.l.bf16 %v1446_v61  ;;  %v1448_v63 = vunpack.i.h.bf16 %v1446_v61 }
 0x278   : > { %820 = vmatpush.msrb.mxu1 %v1447_v62 }
 0x27a   : > { %821 = vmatpush.msrb.mxu1 %v1448_v63 }
 0x2ec   : > { %v1989_v0 = vpop.f32.mrf.mxu3 }
 0x2ef   : > { %v855_v1 = vpop.f32.mrf.mxu2 }
 0x2f0   : > { %v858_v3 = vmul.f32 0.35355338, %v855_v1 }
 0x2f2   : > { %v859_v4 = vadd.f32 %v1968_v30, %v858_v3 }
 0x2f4   : > { %v766_v6 = vpop.f32.mrf.mxu3  ;;  %v860_v7 = vsel %vm682_vm3, %v859_v4, -inf }
 0x2f5   : > { %v769_v8 = vmul.f32 0.35355338, %v766_v6  ;;  %861 = vmax.xlane.f32.xlu0 %v860_v7  ;;  %v648_v6 = vld [vmem:[#allocation9 + $0x18] sm:$0xff]  ;;  %v647_v7 = vld [vmem:[#allocation9 + $0x10] sm:$0xff] }
 0x2f6   : > { %1038 = vmatpush.msra.mxu2 %v648_v6 }
 0x2f7   : > { %v770_v10 = vadd.f32 %v1968_v30, %v769_v8  ;;  %v646_v8 = vld [vmem:[#allocation9 + $0x8] sm:$0xff] }
 0x2f8   : > { %1039 = vmatpush.msra.mxu2 %v647_v7 }
 0x2f9   : > { %v771_v11 = vsel %vm682_vm3, %v770_v10, -inf }
 0x2fa   : > { %772 = vmax.xlane.f32.xlu2 %v771_v11  ;;  %1040 = vmatpush.msra.mxu2 %v646_v8 }
 0x302   : > { %956 = vadd.xlane.f32.xlu2 %v955_v13 }
 0x368   : > { %v862_v14 = vpop.xlane.xlu0 %861 }
 0x369   : > { %v863_v15 = vsub.f32 %v859_v4, %v862_v14 }
 0x36b   : > { %v864_v16 = vmul.f32 1.442695, %v863_v15 }
 0x36d   : > { %1471 = vpow2.f32 %v864_v16  ;;  %v773_v17 = vpop.xlane.xlu2 %772 }
 0x36e   : > { %v774_v18 = vsub.f32 %v770_v10, %v773_v17  ;;  %v645_v10 = vld [vmem:[#allocation9] sm:$0xff]  ;;  %v1462_v17 = vld [vmem:[%s2084_s8] ss:$0 sm:$0xff] }
 0x36f   : > { %1041 = vmatpush.msra.mxu2 %v645_v10 }
 0x370   : > { %v775_v20 = vmul.f32 1.442695, %v774_v18 }
 0x372   : > { %1473 = vpow2.f32 %v775_v20 }
 0x373   : > { %v1472_v21 = vpop.eup %1471 }
 0x374   : > { %v866_v22 = vsel %vm682_vm3, %v1472_v21, 0.0 }
 0x375   : > { %v957_v23 = vpop.xlane.xlu2 %956  ;;  %867 = vadd.xlane.f32.xlu0 %v866_v22 }
 0x376   : > { %1475 = vrcp.f32 %v957_v23  ;;  %v969_v29 = vand.u32 2147483648, %v957_v23  ;;  %v967_v31 = vand.u32 2147483647, %v957_v23  ;;  %vm963_vm9 = vweird.f32 %v957_v23 }
 0x378   : > { %v1997_v24 = vpop.eup %1473  ;;  %v970_v33 = vor.u32 1.1754944e-38, %v969_v29  ;;  %vm968_vm11 = vcmp.eq.f32.partialorder %v967_v31, 8.507059e+37 }
 0x379   : > { %v777_v25 = vsel %vm682_vm3, %v1997_v24, 0.0 }
 0x37a   : > { %778 = vadd.xlane.f32.xlu2 %v777_v25 }
 0x37c   : > { %v1476_v26 = vpop.eup %1475 }
 0x37d   : > { %v959_v27 = vmul.f32 %v1476_v26, %v957_v23  ;;  %vm964_vm8 = vweird.f32 %v1476_v26 }
 0x37e   : > { %vm965_vm10 = vmor %vm963_vm9, %vm964_vm8 }
 0x37f   : > { %v960_v28 = vsub.f32 1.0, %v959_v27 }
 0x381   : > { %v961_v30 = vmul.f32 %v1476_v26, %v960_v28 }
 0x383   : > { %v962_v32 = vadd.f32 %v1476_v26, %v961_v30 }
 0x385   : > { %v966_v34 = vsel %vm965_vm10, %v1476_v26, %v962_v32 }
 0x386   : > { %v971_v35 = vsel %vm968_vm11, %v970_v33, %v966_v34 }
 0x387   : > { %v972_v36 = vmul.f32 %v1470_v12, %v971_v35 }
 0x389   : > { %1450 = vrot.lane.b32.xlu0 %v1954_v19, %s1707_s10  ;;  %1322 = vst.msk [vmem:[%s1981_s18 + $0x18] sm:$0xff] %vm682_vm3, %v972_v36  ;;  %s1619_s10 = sshra.s32 %s1117_s13, 4  ;;  %s1620_s10 = int_to_ptr.hbm [resolvable:$true] %s1619_s10 }
 0x38a   : > { %p1626_p12 = scmp.lt.s32.totalorder %s1620_s10, %s2088_s12 }
 0x392   : > { %1455 = vrot.lane.b32.xlu2 %v1954_v19, %s1708_s21  ;;  %s1621_s21 = scalar_lea.hbm %s1620_s10, 32 }
 0x393   : > { %p1622_p1 = scmp.ne.s32.totalorder %s1620_s10, %s1621_s21 }
 0x395   : > { %p1623_p4 = pnand %p1622_p1, %p1883_p5 }
 0x397   : > { %p1624_p10 = pneg %p1623_p4 }
 0x3e8   : > { %v868_v37 = vpop.xlane.xlu0 %867 }
 0x3e9   : > { %1477 = vrcp.f32 %v868_v37  ;;  %v880_v42 = vand.u32 2147483648, %v868_v37  ;;  %v878_v45 = vand.u32 2147483647, %v868_v37  ;;  %vm874_vm13 = vweird.f32 %v868_v37 }
 0x3eb   : > { %v881_v50 = vor.u32 1.1754944e-38, %v880_v42  ;;  %vm879_vm15 = vcmp.eq.f32.partialorder %v878_v45, 8.507059e+37 }
 0x3ed   : > { %v779_v38 = vpop.xlane.xlu2 %778 }
 0x3ee   : > { %1479 = vrcp.f32 %v779_v38  ;;  %v791_v52 = vand.u32 2147483648, %v779_v38  ;;  %v789_v56 = vand.u32 2147483647, %v779_v38  ;;  %vm785_vm4 = vweird.f32 %v779_v38 }
 0x3ef   : > { %v1478_v39 = vpop.eup %1477 }
 0x3f0   : > { %v870_v40 = vmul.f32 %v1478_v39, %v868_v37  ;;  %vm875_vm12 = vweird.f32 %v1478_v39  ;;  %v792_v60 = vor.u32 1.1754944e-38, %v791_v52  ;;  %vm790_vm6 = vcmp.eq.f32.partialorder %v789_v56, 8.507059e+37 }
 0x3f1   : > { %vm876_vm14 = vmor %vm874_vm13, %vm875_vm12 }
 0x3f2   : > { %v871_v41 = vsub.f32 1.0, %v870_v40 }
 0x3f4   : > { %v1480_v43 = vpop.eup %1479  ;;  %v872_v44 = vmul.f32 %v1478_v39, %v871_v41 }
 0x3f5   : > { %v781_v46 = vmul.f32 %v1480_v43, %v779_v38  ;;  %v1456_v47 = vpop.permute.xlu2 %1455  ;;  %vm786_vm1 = vweird.f32 %v1480_v43 }
 0x3f6   : > { %v873_v48 = vadd.f32 %v1478_v39, %v872_v44  ;;  %v1457_v49 = vunpack.i.l.bf16 %v1456_v47  ;;  %v1458_v53 = vunpack.i.h.bf16 %v1456_v47  ;;  %vm787_vm5 = vmor %vm785_vm4, %vm786_vm1 }
 0x3f7   : > { %v782_v19 = vsub.f32 1.0, %v781_v46 }
 0x3f8   : > { %v877_v51 = vsel %vm876_vm14, %v1478_v39, %v873_v48  ;;  %998 = vmatpush.msra.mxu1 %v1457_v49 }
 0x3f9   : > { %v882_v54 = vsel %vm879_vm15, %v881_v50, %v877_v51  ;;  %v783_v55 = vmul.f32 %v1480_v43, %v782_v19 }
 0x3fa   : > { %999 = vmatpush.msra.mxu1 %v1458_v53  ;;  %v883_v57 = vmul.f32 %v1472_v21, %v882_v54 }
 0x3fb   : > { %v784_v58 = vadd.f32 %v1480_v43, %v783_v55  ;;  %v1451_v59 = vpop.permute.xlu0 %1450 }
 0x3fc   : > { %v1452_v61 = vunpack.i.l.bf16 %v1451_v59  ;;  %1317 = vst.msk [vmem:[%s1981_s18 + $0x10] sm:$0xff] %vm682_vm3, %v883_v57  ;;  %v1453_v63 = vunpack.i.h.bf16 %v1451_v59 }
 0x3fd   : > { %v788_v62 = vsel %vm787_vm5, %v1480_v43, %v784_v58 }
 0x3fe   : > { %909 = vmatpush.msra.mxu3 %v1452_v61  ;;  %v793_v1 = vsel %vm790_vm6, %v792_v60, %v788_v62 }
 0x3ff   : > { %v794_v2 = vmul.f32 %v1997_v24, %v793_v1 }
 0x400   : > { %910 = vmatpush.msra.mxu3 %v1453_v63 }
 0x401   : > { %1312 = vst.msk [vmem:[%s1981_s18 + $0x8] sm:$0xff] %vm682_vm3, %v794_v2  ;;  %1313 = vmatmul.msk.f32.vlgmr.msrb.gmra.mxu1 %vm682_vm3, %v794_v2  ;;  %1318 = vmatmul.msk.f32.vlgmr.msra.gmra.mxu3 %vm682_vm3, %v883_v57  ;;  %s1625_s18 = scalar_lea.hbm %s2088_s12, 64 }
 0x402   : > { %p1627_p13 = scmp.lt.s32.totalorder %s1625_s18, %s1621_s21 }
 0x404   : > { %p1628_p0 = por %p1627_p13, %p1626_p12 }
 0x406   : > { %p1629_p3 = pnand %p1628_p0, %p1624_p10 }
 0x409   : > { %1323 = vmatmul.msk.f32.vlgmr.msra.gmra.mxu1 %vm682_vm3, %v972_v36 }
 0x47e   : > { %v823_v3 = vpop.f32.mrf.mxu1 }
 0x47f   : > { %1005 = vrot.lane.b32.xlu0 %v823_v3, %s1709_s5 }
 0x484   : > { %v912_v4 = vpop.f32.mrf.mxu3 }
 0x485   : > { %1009 = vrot.lane.b32.xlu1 %v912_v4, %s1710_s20 }
 0x486   : > { %v1001_v5 = vpop.f32.mrf.mxu1 }
 0x487   : > { %1013 = vrot.lane.b32.xlu2 %v1001_v5, %s1711_s16 }
 0x4e1   : > { %v1014_v14 = vpop.permute.xlu2 %1013 }
 0x4f1   : > { %v1006_v11 = vpop.permute.xlu0 %1005 }
 0x4f2   : > { %v1016_v12 = vsel %vm650_vm2, %v1989_v0, %v1006_v11 }
 0x4f7   : > { %v1010_v13 = vpop.permute.xlu1 %1009 }
 0x4f8   : > { %v1017_v15 = vsel %vm682_vm3, %v1016_v12, %v1010_v13 }
 0x4f9   : > { %v1019_v16 = vsel %vm1018_vm7, %v1017_v15, %v1014_v14 }
 0x4fa   : > { %1324 = vmatmul.msk.f32.vlgmr.msra.gmra.mxu2 %vm574_vm0, %v1019_v16 }
 0x57d   : > { %v1043_v18 = vpop.f32.mrf.mxu2 }
 0x57e   : > { %v1044_v20 = vadd.f32 %v1462_v17, %v1043_v18 }
 0x580   : > { %v1046_v21 = vadd.f32 %v1044_v20, %v1939_v9 }
 0x582   : > { %v1049_v22 = vsel %vm574_vm0, %v1046_v21, 0.0  ;;  %v1060_v0 = vmul.f32 %v1046_v21, %v1046_v21 }
 0x583   : > { %1050 = vadd.xlane.f32.xlu0 %v1049_v22 }
 0x584   : > { %v1061_v23 = vsel %vm574_vm0, %v1060_v0, 0.0 }
 0x585   : > { %1062 = vadd.xlane.f32.xlu1 %v1061_v23 }
 0x586   : > { %1632 = shalt.err (!%p1629_p3)
}
 0x587   : > { %s1712_s11 = smov 128   ;;  %v1713_v9 = vmov 32.0   ;;  %s2119_s15 = sld [smem:[#allocation23_spill]] }
 0x588   : > { %1346 = dma.vmem_to_hbm [thread:$0]  (%p1883_p5), %s1115_s30, 512, %s1117_s13, %s1098_s29, %s1712_s11, %s1712_s11, %s1709_s5   ;;  %1481 = vrcp.f32 %v1713_v9 }
 0x589   : > { %s2120_s3 = sld [smem:[#allocation24_spill]] }
 0x58a   : > { %s2121_s13 = sld [smem:[#allocation25_spill]] }
 0x58d   : > { %v1463_v45 = vld [vmem:[%s2119_s15] ss:$0 sm:$0xff] }
 0x58e   : > { %v1482_v24 = vpop.eup %1481 }
 0x58f   : > { %v1053_v25 = vmul.f32 32.0, %v1482_v24  ;;  %vm1057_vm2 = vweird.f32 %v1482_v24  ;;  %v1464_v47 = vld [vmem:[%s2120_s3] ss:$0 sm:$0xff] }
 0x590   : > { %s558_s29 = scalar_lea.vmem %s2121_s13, %s1300_s9 }
 0x591   : > { %v1054_v26 = vsub.f32 1.0, %v1053_v25 }
 0x593   : > { %v1055_v27 = vmul.f32 %v1482_v24, %v1054_v26 }
 0x595   : > { %v1056_v28 = vadd.f32 %v1482_v24, %v1055_v27 }
 0x597   : > { %v1058_v29 = vsel %vm1057_vm2, %v1482_v24, %v1056_v28 }
 0x5f6   : > { %v1051_v30 = vpop.xlane.xlu0 %1050 }
 0x5f7   : > { %v1059_v31 = vmul.f32 %v1058_v29, %v1051_v30 }
 0x5f8   : > { %v1063_v32 = vpop.xlane.xlu1 %1062 }
 0x5f9   : > { %v1065_v33 = vmul.f32 %v1059_v31, %v1059_v31  ;;  %v1064_v34 = vmul.f32 %v1063_v32, %v1058_v29  ;;  %v1068_v44 = vsub.f32 %v1046_v21, %v1059_v31 }
 0x5fb   : > { %v1066_v35 = vsub.f32 %v1064_v34, %v1065_v33 }
 0x5fd   : > { %v1067_v36 = vmax.f32 %v1066_v35, 0.0 }
 0x5ff   : > { %v1069_v37 = vadd.f32 1e-05, %v1067_v36 }
 0x601   : > { %1483 = vrsqrt.f32 %v1069_v37  ;;  %vm1076_vm8 = vweird.f32 %v1069_v37 }
 0x607   : > { %v1484_v38 = vpop.eup %1483 }
 0x608   : > { %v1071_v39 = vmul.f32 %v1484_v38, %v1069_v37  ;;  %vm1077_vm3 = vweird.f32 %v1484_v38 }
 0x609   : > { %vm1078_vm9 = vmor %vm1076_vm8, %vm1077_vm3 }
 0x60a   : > { %v1072_v40 = vmul.f32 %v1484_v38, %v1071_v39 }
 0x60c   : > { %v1073_v41 = vmul.f32 0.5, %v1072_v40 }
 0x60e   : > { %v1074_v42 = vsub.f32 1.5, %v1073_v41 }
 0x610   : > { %v1075_v43 = vmul.f32 %v1484_v38, %v1074_v42 }
 0x612   : > { %v1079_v46 = vsel %vm1078_vm9, %v1484_v38, %v1075_v43 }
 0x613   : > { %v1080_v48 = vmul.f32 %v1079_v46, %v1068_v44 }
 0x615   : > { %v1084_v49 = vmul.f32 %v1463_v45, %v1080_v48 }
 0x617   : > { %v1088_v50 = vadd.f32 %v1464_v47, %v1084_v49 }
 0x619   : > { %1089 = vst.msk [vmem:[%s558_s29] sm:$0xff] %vm574_vm0, %v1088_v50 }
 0x61a PF: > { %s2122_s10 = sld [smem:[#allocation16_spill]]  ;;  %p1363_p5 = pnand %p1290_p11, %p1828_p6 }
 0x61b   : > { %s2124_s20 = sld [smem:[#allocation17_spill]] }
 0x61c   : > { %p1364_p7 = pneg %p1363_p5 }
 0x620   : > { %s1141_s16 = sand.u32 1, %s2122_s10  }
 0x621   : > { %s1142_s18 = scalar_lea.sflag [#allocation5], %s1141_s16 }
 0x622   : > { %1670 = dma.done.wait (%p1364_p7), %s1142_s18, 512  }
 0x623   : > { %1672 = vsyncadd (%p1364_p7), %s1142_s18, 4294966784  ;;  %s31_s26 = sadd.s32 1, %s2124_s20   ;;  %s2125_s7 = sld [smem:[#allocation19_spill]] }
 0x624   : > { %p28_p9 = scmp.ge.s32.totalorder %s31_s26, 4   ;;  %s2126_s21 = smov %s1679_s22 }
 0x625   : > { %s2127_s22 = smov %s1683_s23  ;;  %s2128_s23 = smov %s1892_s27 }
 0x626   : > { %s2129_s24 = smov %s1691_s25  ;;  %30 = sbr.rel (!%p28_p9) target bundleno = 15 (0xf), region = 146 }
 0x629   : > { %s2130_s25 = smov %s2125_s7 }
 0x62b   :  { %1148 = vsyncpa [#allocation4], 1 }
 0x62c   :  { %1150 = vsyncpa [#allocation4 + $0x1], 1 }
 0x62d   :  { %1151 = vsyncpa [#allocation7], 1 }
 0x62e   :  { %1152 = vsyncpa [#allocation10], 1 }
 0x62f   :  { %1153 = vsyncpa [#allocation5], 1 }
 0x630   :  { %1155 = vsyncpa [#allocation5 + $0x1], 1 }

// kernel: decoder_layer.5
= control target key start
LH: loop header
LB: loop body
LE: loop exit
PB: predicated region body
PF: predicated region fallthrough
CT: control target
= control target key end

     0   :  { %vm37_vm0 = vcmask 261120   ;;  %s367_s0 = inlined_call_operand.vmem [shape: f32[16,32], index: 0, kind: input, shape index: {}]   ;;  %s368_s1 = inlined_call_operand.vmem [shape: f32[32,64], index: 1, kind: input, shape index: {}]   ;;  %s369_s2 = inlined_call_operand.vmem [shape: f32[1,64], index: 2, kind: input, shape index: {}]   ;;  %s370_s3 = inlined_call_operand.vmem [shape: f32[64,32], index: 3, kind: input, shape index: {}]   ;;  %s371_s4 = inlined_call_operand.vmem [shape: f32[1,32], index: 4, kind: input, shape index: {}]   ;;  %s372_s5 = inlined_call_operand.vmem [shape: f32[1,32], index: 5, kind: input, shape index: {}]   ;;  %s373_s6 = inlined_call_operand.vmem [shape: f32[1,32], index: 6, kind: input, shape index: {}]   ;;  %s374_s7 = inlined_call_operand.hbm [shape: f32[16,32], index: 7, kind: output, shape index: {}]  }
   0x1   :  { %v32_v0 = vld [vmem:[%s368_s1 + $0x18] sm:$0xff]  ;;  %v31_v1 = vld [vmem:[%s368_s1 + $0x10] sm:$0xff]  ;;  %v30_v2 = vld [vmem:[%s368_s1 + $0x8] sm:$0xff] }
   0x2   :  { %56 = vmatpush.msra.mxu0 %v32_v0  ;;  %206 = vmatpush.msra.mxu3 %v32_v0  ;;  %v76_v3 = vld [vmem:[%s370_s3 + $0x38] sm:$0xff]  ;;  %v29_v4 = vld [vmem:[%s368_s1] sm:$0xff]  ;;  %v75_v5 = vld [vmem:[%s370_s3 + $0x30] sm:$0xff] }
   0x3   :  { %v27_v6 = vld [vmem:[%s367_s0] sm:$0xff]  ;;  %96 = vmatpush.msra.mxu1 %v76_v3  ;;  %210 = vmatpush.msra.mxu2 %v76_v3  ;;  %v28_v7 = vld [vmem:[%s367_s0 + $0x8] sm:$0xff] }
   0x4   :  { %57 = vmatpush.msra.mxu0 %v31_v1  ;;  %207 = vmatpush.msra.mxu3 %v31_v1 }
   0x6   :  { %58 = vmatpush.msra.mxu0 %v30_v2  ;;  %208 = vmatpush.msra.mxu3 %v30_v2 }
   0x7   :  { %12 = vsyncpa [#allocation3], 0  ;;  %97 = vmatpush.msra.mxu1 %v75_v5  ;;  %v74_v8 = vld [vmem:[%s370_s3 + $0x28] sm:$0xff]  ;;  %211 = vmatpush.msra.mxu2 %v75_v5  ;;  %v73_v9 = vld [vmem:[%s370_s3 + $0x20] sm:$0xff]  ;;  %vm81_vm1 = vcmask 523264   ;;  %v258_v34 = vmov 32.0  }
   0x8   :  { %59 = vmatpush.msra.mxu0 %v29_v4  ;;  %209 = vmatpush.msra.mxu3 %v29_v4  ;;  %v72_v10 = vld [vmem:[%s370_s3 + $0x18] sm:$0xff]  ;;  %v71_v11 = vld [vmem:[%s370_s3 + $0x10] sm:$0xff]  ;;  %v70_v12 = vld [vmem:[%s370_s3 + $0x8] sm:$0xff]  ;;  %226 = vrcp.f32 %v258_v34  ;;  %s260_s12 = smov 128   ;;  %s261_s13 = smov 8  }
   0x9   :  { %202 = vmatmul.msk.f32.vlgmr.msra.gmra.mxu0 %vm37_vm0, %v27_v6  ;;  %203 = vmatmul.msk.f32.vlgmr.msra.gmra.mxu3 %vm37_vm0, %v28_v7  ;;  %v69_v13 = vld [vmem:[%s370_s3] sm:$0xff] }
   0xa   :  { %98 = vmatpush.msra.mxu1 %v74_v8  ;;  %212 = vmatpush.msra.mxu2 %v74_v8  ;;  %v222_v14 = vld [vmem:[%s369_s2] ss:$0 sm:$0xff] }
   0xb   :  { %v223_v21 = vld [vmem:[%s371_s4] ss:$0 sm:$0xff] }
   0xc   :  { %99 = vmatpush.msra.mxu1 %v73_v9  ;;  %213 = vmatpush.msra.mxu2 %v73_v9  ;;  %v224_v0 = vld [vmem:[%s372_s5] ss:$0 sm:$0xff]  ;;  %s259_s5 = smov [#allocation2]  }
   0xd   :  { %v225_v4 = vld [vmem:[%s373_s6] ss:$0 sm:$0xff]  ;;  %s188_s9 = sshll.u32 %s259_s5, 4  ;;  %s190_s6 = sshll.u32 %s374_s7, 4  ;;  %s189_s9 = int_to_ptr.vmem [resolvable:$true] %s188_s9  ;;  %s191_s6 = int_to_ptr.hbm [resolvable:$true] %s190_s6 }
   0xe   :  { %100 = vmatpush.msra.mxu1 %v72_v10  ;;  %214 = vmatpush.msra.mxu2 %v72_v10  ;;  %v227_v35 = vpop.eup %226 }
   0xf   :  { %v122_v36 = vmul.f32 32.0, %v227_v35  ;;  %vm126_vm2 = vweird.f32 %v227_v35 }
  0x10   :  { %101 = vmatpush.msra.mxu1 %v71_v11  ;;  %215 = vmatpush.msra.mxu2 %v71_v11 }
  0x11   :  { %v123_v37 = vsub.f32 1.0, %v122_v36 }
  0x12   :  { %102 = vmatpush.msra.mxu1 %v70_v12  ;;  %216 = vmatpush.msra.mxu2 %v70_v12 }
  0x13   :  { %v124_v38 = vmul.f32 %v227_v35, %v123_v37 }
  0x14   :  { %103 = vmatpush.msra.mxu1 %v69_v13  ;;  %217 = vmatpush.msra.mxu2 %v69_v13 }
  0x15   :  { %v125_v39 = vadd.f32 %v227_v35, %v124_v38 }
  0x17   :  { %v127_v40 = vsel %vm126_vm2, %v227_v35, %v125_v39 }
  0x86   :  { %v61_v15 = vpop.f32.mrf.mxu0 }
  0x87   :  { %v62_v16 = vadd.f32 %v222_v14, %v61_v15 }
  0x89   :  { %v67_v17 = vmax.f32 %v62_v16, 0.0 }
  0x8b   :  { %204 = vmatmul.msk.f32.vlgmr.msra.gmra.mxu1 %vm81_vm1, %v67_v17 }
  0x8c   :  { %v64_v18 = vpop.f32.mrf.mxu3 }
  0x8d   :  { %v65_v19 = vadd.f32 %v222_v14, %v64_v18 }
  0x8f   :  { %v68_v20 = vmax.f32 %v65_v19, 0.0 }
  0x91   :  { %205 = vmatmul.msk.f32.vlgmr.msra.gmra.mxu2 %vm81_vm1, %v68_v20 }
 0x108   :  { %v105_v22 = vpop.f32.mrf.mxu1 }
 0x109   :  { %v106_v23 = vadd.f32 %v223_v21, %v105_v22 }
 0x10b   :  { %v111_v24 = vadd.f32 %v106_v23, %v27_v6 }
 0x10d   :  { %v115_v25 = vsel %vm37_vm0, %v111_v24, 0.0  ;;  %v130_v26 = vmul.f32 %v111_v24, %v111_v24 }
 0x10e   :  { %116 = vadd.xlane.f32.xlu0 %v115_v25 }
 0x10f   :  { %v132_v27 = vsel %vm37_vm0, %v130_v26, 0.0 }
 0x110   :  { %133 = vadd.xlane.f32.xlu1 %v132_v27 }
 0x114   :  { %v108_v28 = vpop.f32.mrf.mxu2 }
 0x115   :  { %v109_v29 = vadd.f32 %v223_v21, %v108_v28 }
 0x117   :  { %v112_v30 = vadd.f32 %v109_v29, %v28_v7 }
 0x119   :  { %v118_v31 = vsel %vm37_vm0, %v112_v30, 0.0  ;;  %v131_v32 = vmul.f32 %v112_v30, %v112_v30 }
 0x11a   :  { %119 = vadd.xlane.f32.xlu0 %v118_v31 }
 0x11b   :  { %v135_v33 = vsel %vm37_vm0, %v131_v32, 0.0 }
 0x11c   :  { %136 = vadd.xlane.f32.xlu1 %v135_v33 }
 0x181   :  { %v117_v41 = vpop.xlane.xlu0 %116 }
 0x182   :  { %v128_v42 = vmul.f32 %v127_v40, %v117_v41 }
 0x183   :  { %v134_v43 = vpop.xlane.xlu1 %133 }
 0x184   :  { %v140_v44 = vmul.f32 %v128_v42, %v128_v42  ;;  %v138_v45 = vmul.f32 %v134_v43, %v127_v40  ;;  %v146_v63 = vsub.f32 %v111_v24, %v128_v42 }
 0x186   :  { %v142_v46 = vsub.f32 %v138_v45, %v140_v44 }
 0x188   :  { %v144_v47 = vmax.f32 %v142_v46, 0.0 }
 0x18a   :  { %v148_v48 = vadd.f32 1e-05, %v144_v47 }
 0x18c   :  { %228 = vrsqrt.f32 %v148_v48  ;;  %vm156_vm4 = vweird.f32 %v148_v48 }
 0x18d   :  { %v120_v49 = vpop.xlane.xlu0 %119 }
 0x18e   :  { %v129_v50 = vmul.f32 %v127_v40, %v120_v49 }
 0x18f   :  { %v137_v51 = vpop.xlane.xlu1 %136 }
 0x190   :  { %v141_v52 = vmul.f32 %v129_v50, %v129_v50  ;;  %v139_v53 = vmul.f32 %v137_v51, %v127_v40  ;;  %v147_v12 = vsub.f32 %v112_v30, %v129_v50 }
 0x192   :  { %v229_v54 = vpop.eup %228  ;;  %v143_v55 = vsub.f32 %v139_v53, %v141_v52 }
 0x193   :  { %v151_v56 = vmul.f32 %v229_v54, %v148_v48  ;;  %vm157_vm3 = vweird.f32 %v229_v54 }
 0x194   :  { %v145_v57 = vmax.f32 %v143_v55, 0.0  ;;  %vm158_vm5 = vmor %vm156_vm4, %vm157_vm3 }
 0x195   :  { %v152_v58 = vmul.f32 %v229_v54, %v151_v56 }
 0x196   :  { %v149_v59 = vadd.f32 1e-05, %v145_v57 }
 0x197   :  { %v153_v60 = vmul.f32 0.5, %v152_v58 }
 0x198   :  { %230 = vrsqrt.f32 %v149_v59  ;;  %vm166_vm7 = vweird.f32 %v149_v59 }
 0x199   :  { %v154_v61 = vsub.f32 1.5, %v153_v60 }
 0x19b   :  { %v155_v62 = vmul.f32 %v229_v54, %v154_v61 }
 0x19d   :  { %v159_v1 = vsel %vm158_vm5, %v229_v54, %v155_v62 }
 0x19e   :  { %v231_v2 = vpop.eup %230  ;;  %v170_v3 = vmul.f32 %v159_v1, %v146_v63 }
 0x19f   :  { %v161_v5 = vmul.f32 %v231_v2, %v149_v59  ;;  %vm167_vm6 = vweird.f32 %v231_v2 }
 0x1a0   :  { %v175_v6 = vmul.f32 %v224_v0, %v170_v3  ;;  %vm168_vm8 = vmor %vm166_vm7, %vm167_vm6 }
 0x1a1   :  { %v162_v7 = vmul.f32 %v231_v2, %v161_v5 }
 0x1a2   :  { %v180_v8 = vadd.f32 %v225_v4, %v175_v6 }
 0x1a3   :  { %v163_v9 = vmul.f32 0.5, %v162_v7 }
 0x1a4   :  { %182 = vst.msk [vmem:[#allocation2] sm:$0xff] %vm37_vm0, %v180_v8 }
 0x1a5   :  { %v164_v10 = vsub.f32 1.5, %v163_v9 }
 0x1a7   :  { %v165_v11 = vmul.f32 %v231_v2, %v164_v10 }
 0x1a9   :  { %v169_v13 = vsel %vm168_vm8, %v231_v2, %v165_v11 }
 0x1aa   :  { %v171_v14 = vmul.f32 %v169_v13, %v147_v12 }
 0x1ac   :  { %v176_v15 = vmul.f32 %v224_v0, %v171_v14 }
 0x1ae   :  { %v181_v16 = vadd.f32 %v225_v4, %v176_v15 }
 0x1b0   :  { %183 = vst.msk [vmem:[#allocation2 + $0x8] sm:$0xff] %vm37_vm0, %v181_v16 }
 0x1b1   :  { %196 = dma.vmem_to_hbm [thread:$0]  %s189_s9, 256, %s191_s6, [#allocation3], %s260_s12, %s260_s12, %s261_s13  }
 0x1b2   :  { %256 = dma.done.wait [#allocation3], 256  }
 0x1b3   :  { %257 = vsyncadd [#allocation3], 4294967040 }
 0x1b4   :  { %201 = vsyncpa [#allocation3], 1 }

</bundles_post_ra>
